<compile_context>
chip_gen: v6e
topology: v6e:2x2x1
jax: 0.10.0
libtpu: 0.0.40
codegen_flags: <defaults>
</compile_context>

<pallas_src>
import functools

import jax
import jax.numpy as jnp
from jax.experimental import pallas as pl
from jax.experimental.pallas import tpu as pltpu

EXPANSION = 4
TILE_M = 256  # row tile (multiple of 8); fits v5e/v6e/v7x VMEM budgets with headroom


def _pick_tile(m, tile):
    return m if m <= tile else tile


def fold_bn(gamma, beta, mean, var, eps=1e-5):
    scale = gamma / jnp.sqrt(var + eps)
    bias = beta - mean * scale
    return scale.astype(jnp.float32), bias.astype(jnp.float32)


# ---------------------------------------------------------------------------
# kernel 1: fused (X @ W) * scale + bias, ReLU     (conv1 1x1 + bn1 + relu)
# ---------------------------------------------------------------------------
def _mm_bn_relu_kernel(x_ref, w_ref, s_ref, b_ref, o_ref):
    acc = jnp.dot(x_ref[...], w_ref[...], preferred_element_type=jnp.float32)
    o_ref[...] = jnp.maximum(acc * s_ref[...] + b_ref[...], 0.0).astype(o_ref.dtype)


def matmul_bn_relu(x, w, scale, bias, out_dtype=jnp.bfloat16, tile_m=TILE_M):
    m, k = x.shape
    n = w.shape[1]
    tm = _pick_tile(m, tile_m)
    cost = pl.CostEstimate(
        flops=2 * m * k * n, transcendentals=0,
        bytes_accessed=int(x.size * x.dtype.itemsize + w.size * w.dtype.itemsize
                           + m * n * jnp.dtype(out_dtype).itemsize))
    return pl.pallas_call(
        _mm_bn_relu_kernel,
        out_shape=jax.ShapeDtypeStruct((m, n), out_dtype),
        grid=(pl.cdiv(m, tm),),
        in_specs=[
            pl.BlockSpec((tm, k), lambda i: (i, 0)),
            pl.BlockSpec((k, n), lambda i: (0, 0)),   # VMEM-resident across grid
            pl.BlockSpec((1, n), lambda i: (0, 0)),
            pl.BlockSpec((1, n), lambda i: (0, 0)),
        ],
        out_specs=pl.BlockSpec((tm, n), lambda i: (i, 0)),
        compiler_params=pltpu.CompilerParams(dimension_semantics=("parallel",)),
        cost_estimate=cost,
    )(x, w, scale.reshape(1, n), bias.reshape(1, n))


# ---------------------------------------------------------------------------
# kernel 2: conv2 (3x3, stride 2, pad 1) + bn2 + relu, one image per grid step.
#   Input is the zero-padded conv1 output, de-interleaved into 4 parity planes
#   (even/odd rows x even/odd cols) so every stride-2 tap is a contiguous slice.
# ---------------------------------------------------------------------------
def _conv2_kernel(xd_ref, w2_ref, s_ref, b_ref, o_ref, *, ho, wo):
    # xd_ref: (4, Hq, Wq, C1) bf16   plane index p = 2*row_parity + col_parity
    # w2_ref: (9, C1, C1)     bf16   tap-major (kh*3 + kw), layout (tap, cin, cout)
    c_out = w2_ref.shape[2]
    planes = [xd_ref[i] for i in range(4)]
    acc = jnp.zeros((ho * wo, c_out), jnp.float32)
    for kh in range(3):
        pr, r0 = kh % 2, kh // 2
        for kw in range(3):
            pc, c0 = kw % 2, kw // 2
            tap = planes[2 * pr + pc][r0:r0 + ho, c0:c0 + wo, :]   # (ho, wo, C1)
            acc = acc + jnp.dot(tap.reshape(ho * wo, tap.shape[-1]),
                                w2_ref[kh * 3 + kw],
                                preferred_element_type=jnp.float32)
    o_ref[...] = jnp.maximum(acc * s_ref[...] + b_ref[...], 0.0).astype(o_ref.dtype)


def conv2_3x3_s2_bn_relu(h1_deint, w2, scale, bias, ho, wo, out_dtype=jnp.bfloat16):
    n, _, hq, wq, c_in = h1_deint.shape
    c_out = w2.shape[2]
    kern = functools.partial(_conv2_kernel, ho=ho, wo=wo)
    cost = pl.CostEstimate(
        flops=2 * n * ho * wo * 9 * c_in * c_out, transcendentals=0,
        bytes_accessed=int(h1_deint.size * h1_deint.dtype.itemsize
                           + w2.size * w2.dtype.itemsize
                           + n * ho * wo * c_out * jnp.dtype(out_dtype).itemsize))
    return pl.pallas_call(
        kern,
        out_shape=jax.ShapeDtypeStruct((n, ho * wo, c_out), out_dtype),
        grid=(n,),
        in_specs=[
            pl.BlockSpec((None, 4, hq, wq, c_in), lambda i: (i, 0, 0, 0, 0)),
            pl.BlockSpec((9, c_in, c_out), lambda i: (0, 0, 0)),   # resident weights
            pl.BlockSpec((1, c_out), lambda i: (0, 0)),
            pl.BlockSpec((1, c_out), lambda i: (0, 0)),
        ],
        out_specs=pl.BlockSpec((None, ho * wo, c_out), lambda i: (i, 0, 0)),
        compiler_params=pltpu.CompilerParams(dimension_semantics=("parallel",)),
        cost_estimate=cost,
    )(h1_deint, w2, scale.reshape(1, c_out), bias.reshape(1, c_out))


# ---------------------------------------------------------------------------
# kernel 3: conv3 (1x1) + bn3  fused with downsample (1x1 s2) + bn, add, relu
# ---------------------------------------------------------------------------
def _conv3_ds_add_relu_kernel(h_ref, xd_ref, w3_ref, wd_ref,
                              s3_ref, b3_ref, sd_ref, bd_ref, o_ref):
    main = jnp.dot(h_ref[...], w3_ref[...], preferred_element_type=jnp.float32)
    iden = jnp.dot(xd_ref[...], wd_ref[...], preferred_element_type=jnp.float32)
    y = (main * s3_ref[...] + b3_ref[...]) + (iden * sd_ref[...] + bd_ref[...])
    o_ref[...] = jnp.maximum(y, 0.0).astype(o_ref.dtype)


def conv3_downsample_add_relu(h, xd, w3, wd, s3, b3, sd, bd,
                              out_dtype=jnp.float32, tile_m=TILE_M):
    m, k3 = h.shape
    kd = xd.shape[1]
    n = w3.shape[1]
    tm = _pick_tile(m, tile_m)
    cost = pl.CostEstimate(
        flops=2 * m * n * (k3 + kd), transcendentals=0,
        bytes_accessed=int(h.size * h.dtype.itemsize + xd.size * xd.dtype.itemsize
                           + w3.size * w3.dtype.itemsize + wd.size * wd.dtype.itemsize
                           + m * n * jnp.dtype(out_dtype).itemsize))
    return pl.pallas_call(
        _conv3_ds_add_relu_kernel,
        out_shape=jax.ShapeDtypeStruct((m, n), out_dtype),
        grid=(pl.cdiv(m, tm),),
        in_specs=[
            pl.BlockSpec((tm, k3), lambda i: (i, 0)),
            pl.BlockSpec((tm, kd), lambda i: (i, 0)),
            pl.BlockSpec((k3, n), lambda i: (0, 0)),
            pl.BlockSpec((kd, n), lambda i: (0, 0)),
            pl.BlockSpec((1, n), lambda i: (0, 0)),
            pl.BlockSpec((1, n), lambda i: (0, 0)),
            pl.BlockSpec((1, n), lambda i: (0, 0)),
            pl.BlockSpec((1, n), lambda i: (0, 0)),
        ],
        out_specs=pl.BlockSpec((tm, n), lambda i: (i, 0)),
        compiler_params=pltpu.CompilerParams(dimension_semantics=("parallel",)),
        cost_estimate=cost,
    )(h, xd, w3, wd, s3.reshape(1, n), b3.reshape(1, n),
      sd.reshape(1, n), bd.reshape(1, n))


# ---------------------------------------------------------------------------
# Bottleneck forward (NCHW in / NCHW out, like the PyTorch module).
# ---------------------------------------------------------------------------
@jax.jit
def bottleneck_forward(x_nchw, p):
    bf16 = jnp.bfloat16
    x = jnp.transpose(x_nchw, (0, 2, 3, 1)).astype(bf16)   # NHWC, bf16 MXU inputs
    n, h, w, c_in = x.shape
    c1 = p["w1"].shape[1]
    c_out = p["w3"].shape[1]

    # conv1 (1x1) + bn1 + relu  -- M-tiled fused matmul
    h1 = matmul_bn_relu(x.reshape(n * h * w, c_in), p["w1"].astype(bf16),
                        p["s1"], p["b1"])
    h1 = h1.reshape(n, h, w, c1)

    # conv2 (3x3, stride 2, pad 1) + bn2 + relu
    ho = (h + 2 - 3) // 2 + 1
    wo = (w + 2 - 3) // 2 + 1
    hp = h + 2 + ((h + 2) % 2)        # pad to even so even/odd de-interleave is exact
    wp = w + 2 + ((w + 2) % 2)
    h1p = jnp.pad(h1, ((0, 0), (1, hp - h - 1), (1, wp - w - 1), (0, 0)))
    hq, wq = hp // 2, wp // 2
    # de-interleave even/odd rows & cols -> (N, 4, Hq, Wq, C1)
    h1d = (h1p.reshape(n, hq, 2, wq, 2, c1)
              .transpose(0, 2, 4, 1, 3, 5)
              .reshape(n, 4, hq, wq, c1))
    h2 = conv2_3x3_s2_bn_relu(h1d, p["w2"].astype(bf16), p["s2"], p["b2"], ho, wo)

    # conv3 (1x1) + bn3  fused with downsample (1x1 stride-2 + bn) + add + relu
    xd = x[:, ::2, ::2, :][:, :ho, :wo, :].reshape(n * ho * wo, c_in)
    out = conv3_downsample_add_relu(h2.reshape(n * ho * wo, c1), xd,
                                    p["w3"].astype(bf16), p["wd"].astype(bf16),
                                    p["s3"], p["b3"], p["sd"], p["bd"])
    out = out.reshape(n, ho, wo, c_out)
    return jnp.transpose(out, (0, 3, 1, 2))                # -> NCHW, f32


# ---------------------------------------------------------------------------
# Pure-JAX reference (lax convs) with the same bf16-input / f32-accumulate
# precision policy, for a correctness check.
# ---------------------------------------------------------------------------
@jax.jit
def reference_forward(x_nchw, p):
    bf16 = jnp.bfloat16
    dn = ("NHWC", "HWIO", "NHWC")
    x = jnp.transpose(x_nchw, (0, 2, 3, 1)).astype(bf16)
    c_in = x.shape[-1]
    c1 = p["w1"].shape[1]
    c_out = p["w3"].shape[1]

    def conv(inp, w_hwio, stride, pad):
        return jax.lax.conv_general_dilated(
            inp.astype(bf16), w_hwio.astype(bf16), stride, pad,
            dimension_numbers=dn, preferred_element_type=jnp.float32)

    def affine(y, s, b):
        return y * s + b

    o = conv(x, p["w1"].reshape(1, 1, c_in, c1), (1, 1), [(0, 0), (0, 0)])
    o = jnp.maximum(affine(o, p["s1"], p["b1"]), 0.0).astype(bf16)
    o = conv(o, p["w2"].reshape(3, 3, c1, c1), (2, 2), [(1, 1), (1, 1)])
    o = jnp.maximum(affine(o, p["s2"], p["b2"]), 0.0).astype(bf16)
    o = conv(o, p["w3"].reshape(1, 1, c1, c_out), (1, 1), [(0, 0), (0, 0)])
    o = affine(o, p["s3"], p["b3"])
    ident = conv(x, p["wd"].reshape(1, 1, c_in, c_out), (2, 2), [(0, 0), (0, 0)])
    ident = affine(ident, p["sd"], p["bd"])
    o = jnp.maximum(o + ident, 0.0)
    return jnp.transpose(o, (0, 3, 1, 2)).astype(jnp.float32)


# ---------------------------------------------------------------------------
# Deterministic synthetic parameters.
# ---------------------------------------------------------------------------
def make_params(key, in_channel, out_channel):
    c_exp = out_channel * EXPANSION
    ks = jax.random.split(key, 8)

    def w(k, shape, fan_in):
        return jax.random.normal(k, shape, jnp.float32) / jnp.sqrt(fan_in)

    def bn(k, c):
        kg, kb, km, kv = jax.random.split(k, 4)
        gamma = 1.0 + 0.1 * jax.random.normal(kg, (c,), jnp.float32)
        beta = 0.1 * jax.random.normal(kb, (c,), jnp.float32)
        mean = 0.1 * jax.random.normal(km, (c,), jnp.float32)
        var = jnp.abs(jax.random.normal(kv, (c,), jnp.float32)) + 0.5
        return fold_bn(gamma, beta, mean, var)

    p = {}
    p["w1"] = w(ks[0], (in_channel, out_channel), in_channel)               # 1x1
    p["s1"], p["b1"] = bn(ks[1], out_channel)
    p["w2"] = w(ks[2], (9, out_channel, out_channel), 9 * out_channel)      # 3x3 taps
    p["s2"], p["b2"] = bn(ks[3], out_channel)
    p["w3"] = w(ks[4], (out_channel, c_exp), out_channel)                   # 1x1
    p["s3"], p["b3"] = bn(ks[5], c_exp)
    p["wd"] = w(ks[6], (in_channel, c_exp), in_channel)                     # downsample
    p["sd"], p["bd"] = bn(ks[7], c_exp)
    return p


if __name__ == "__main__":
    key = jax.random.PRNGKey(0)
    kx, kp = jax.random.split(key)

    n, c_in, h, w = 2, 8, 16, 16    # x in NCHW, like the PyTorch module
    out_channel = 4                 # -> output channels = 16, spatial 8x8 (stride 2)

    x = jax.random.normal(kx, (n, c_in, h, w), jnp.float32)
    params = make_params(kp, c_in, out_channel)

    out = jax.block_until_ready(bottleneck_forward(x, params))
    ref = jax.block_until_ready(reference_forward(x, params))

    assert out.shape == (n, out_channel * EXPANSION, h // 2, w // 2), out.shape
    max_err = float(jnp.max(jnp.abs(out - ref)))
    assert jnp.allclose(out, ref, atol=2e-2, rtol=2e-2), max_err
    print("KERNEL_OK")
</pallas_src>

<mosaic_0001>
module attributes {stable_mosaic.version = 11 : i64} {
  func.func @_mm_bn_relu_kernel(%arg0: i32, %arg1: memref<256x8xbf16, #tpu.memory_space<vmem>>, %arg2: memref<8x4xbf16, #tpu.memory_space<vmem>>, %arg3: memref<1x4xf32, #tpu.memory_space<vmem>>, %arg4: memref<1x4xf32, #tpu.memory_space<vmem>>, %arg5: memref<256x4xbf16, #tpu.memory_space<vmem>>) attributes {dimension_semantics = [#tpu.dimension_semantics<parallel>], iteration_bounds = array<i64: 2>, scalar_prefetch = 0 : i64, scratch_operands = 0 : i64, tpu.core_type = #tpu.core_type<tc>, window_params = [{transform_indices = @transform_0, window_bounds = array<i64: 256, 8>}, {pipeline_mode = #tpu.pipeline_mode<synchronous>, transform_indices = @transform_1, window_bounds = array<i64: 8, 4>}, {pipeline_mode = #tpu.pipeline_mode<synchronous>, transform_indices = @transform_2, window_bounds = array<i64: 1, 4>}, {pipeline_mode = #tpu.pipeline_mode<synchronous>, transform_indices = @transform_3, window_bounds = array<i64: 1, 4>}, {transform_indices = @transform_4, window_bounds = array<i64: 256, 4>}]} {
    %c0 = arith.constant 0 : index
    %c0_0 = arith.constant 0 : index
    %0 = vector.load %arg1[%c0, %c0_0] : memref<256x8xbf16, #tpu.memory_space<vmem>>, vector<256x8xbf16>
    %c0_1 = arith.constant 0 : index
    %c0_2 = arith.constant 0 : index
    %1 = vector.load %arg2[%c0_1, %c0_2] : memref<8x4xbf16, #tpu.memory_space<vmem>>, vector<8x4xbf16>
    %cst = arith.constant dense<0.000000e+00> : vector<256x4xf32>
    %2 = tpu.matmul %0, %1, %cst {dimension_numbers = #tpu.dot_dimension_numbers<[1], [0], [0], [1], [0, 0, 1, 1], [], []>} : vector<256x8xbf16>, vector<8x4xbf16>, vector<256x4xf32> -> vector<256x4xf32>
    %c0_3 = arith.constant 0 : index
    %c0_4 = arith.constant 0 : index
    %3 = vector.load %arg3[%c0_3, %c0_4] : memref<1x4xf32, #tpu.memory_space<vmem>>, vector<1x4xf32>
    %4 = vector.broadcast %3 : vector<1x4xf32> to vector<256x4xf32>
    %5 = arith.mulf %2, %4 : vector<256x4xf32>
    %c0_5 = arith.constant 0 : index
    %c0_6 = arith.constant 0 : index
    %6 = vector.load %arg4[%c0_5, %c0_6] : memref<1x4xf32, #tpu.memory_space<vmem>>, vector<1x4xf32>
    %7 = vector.broadcast %6 : vector<1x4xf32> to vector<256x4xf32>
    %8 = arith.addf %5, %7 : vector<256x4xf32>
    %cst_7 = arith.constant 0.000000e+00 : f32
    %9 = vector.broadcast %cst_7 : f32 to vector<256x4xf32>
    %10 = arith.maximumf %8, %9 : vector<256x4xf32>
    %11 = arith.truncf %10 : vector<256x4xf32> to vector<256x4xbf16>
    %c0_8 = arith.constant 0 : index
    %c0_9 = arith.constant 0 : index
    %12 = vector.load %arg5[%c0_8, %c0_9] : memref<256x4xbf16, #tpu.memory_space<vmem>>, vector<256x4xbf16>
    tpu.vector_store %arg5[%c0_8, %c0_9], %11 {strides = array<i32>} : memref<256x4xbf16, #tpu.memory_space<vmem>>, vector<256x4xbf16>,
    return
  }
  func.func @transform_0(%arg0: i32) -> (i32, i32) {
    %c0_i32 = arith.constant 0 : i32
    %c0_i32_0 = arith.constant 0 : i32
    return %arg0, %c0_i32 : i32, i32
  }
  func.func @transform_1(%arg0: i32) -> (i32, i32) {
    %c0_i32 = arith.constant 0 : i32
    %c0_i32_0 = arith.constant 0 : i32
    %c0_i32_1 = arith.constant 0 : i32
    return %c0_i32, %c0_i32_0 : i32, i32
  }
  func.func @transform_2(%arg0: i32) -> (i32, i32) {
    %c0_i32 = arith.constant 0 : i32
    %c0_i32_0 = arith.constant 0 : i32
    %c0_i32_1 = arith.constant 0 : i32
    return %c0_i32, %c0_i32_0 : i32, i32
  }
  func.func @transform_3(%arg0: i32) -> (i32, i32) {
    %c0_i32 = arith.constant 0 : i32
    %c0_i32_0 = arith.constant 0 : i32
    %c0_i32_1 = arith.constant 0 : i32
    return %c0_i32, %c0_i32_0 : i32, i32
  }
  func.func @transform_4(%arg0: i32) -> (i32, i32) {
    %c0_i32 = arith.constant 0 : i32
    %c0_i32_0 = arith.constant 0 : i32
    return %arg0, %c0_i32 : i32, i32
  }
}

module attributes {stable_mosaic.version = 11 : i64} {
  func.func @_conv2_kernel(%arg0: i32, %arg1: memref<1x4x9x9x4xbf16, #tpu.memory_space<vmem>>, %arg2: memref<9x4x4xbf16, #tpu.memory_space<vmem>>, %arg3: memref<1x4xf32, #tpu.memory_space<vmem>>, %arg4: memref<1x4xf32, #tpu.memory_space<vmem>>, %arg5: memref<1x64x4xbf16, #tpu.memory_space<vmem>>) attributes {dimension_semantics = [#tpu.dimension_semantics<parallel>], iteration_bounds = array<i64: 2>, scalar_prefetch = 0 : i64, scratch_operands = 0 : i64, tpu.core_type = #tpu.core_type<tc>, window_params = [{transform_indices = @transform_0, window_bounds = array<i64: 1, 4, 9, 9, 4>}, {pipeline_mode = #tpu.pipeline_mode<synchronous>, transform_indices = @transform_1, window_bounds = array<i64: 9, 4, 4>}, {pipeline_mode = #tpu.pipeline_mode<synchronous>, transform_indices = @transform_2, window_bounds = array<i64: 1, 4>}, {pipeline_mode = #tpu.pipeline_mode<synchronous>, transform_indices = @transform_3, window_bounds = array<i64: 1, 4>}, {transform_indices = @transform_4, window_bounds = array<i64: 1, 64, 4>}]} {
    %c0 = arith.constant 0 : index
    %c0_0 = arith.constant 0 : index
    %c0_1 = arith.constant 0 : index
    %c0_2 = arith.constant 0 : index
    %c0_3 = arith.constant 0 : index
    %0 = vector.load %arg1[%c0, %c0_0, %c0_1, %c0_2, %c0_3] : memref<1x4x9x9x4xbf16, #tpu.memory_space<vmem>>, vector<1x1x9x9x4xbf16>
    %1 = vector.shape_cast %0 : vector<1x1x9x9x4xbf16> to vector<9x9x4xbf16>
    %c0_4 = arith.constant 0 : index
    %c1 = arith.constant 1 : index
    %c0_5 = arith.constant 0 : index
    %c0_6 = arith.constant 0 : index
    %c0_7 = arith.constant 0 : index
    %2 = vector.load %arg1[%c0_4, %c1, %c0_5, %c0_6, %c0_7] : memref<1x4x9x9x4xbf16, #tpu.memory_space<vmem>>, vector<1x1x9x9x4xbf16>
    %3 = vector.shape_cast %2 : vector<1x1x9x9x4xbf16> to vector<9x9x4xbf16>
    %c0_8 = arith.constant 0 : index
    %c2 = arith.constant 2 : index
    %c0_9 = arith.constant 0 : index
    %c0_10 = arith.constant 0 : index
    %c0_11 = arith.constant 0 : index
    %4 = vector.load %arg1[%c0_8, %c2, %c0_9, %c0_10, %c0_11] : memref<1x4x9x9x4xbf16, #tpu.memory_space<vmem>>, vector<1x1x9x9x4xbf16>
    %5 = vector.shape_cast %4 : vector<1x1x9x9x4xbf16> to vector<9x9x4xbf16>
    %c0_12 = arith.constant 0 : index
    %c3 = arith.constant 3 : index
    %c0_13 = arith.constant 0 : index
    %c0_14 = arith.constant 0 : index
    %c0_15 = arith.constant 0 : index
    %6 = vector.load %arg1[%c0_12, %c3, %c0_13, %c0_14, %c0_15] : memref<1x4x9x9x4xbf16, #tpu.memory_space<vmem>>, vector<1x1x9x9x4xbf16>
    %7 = vector.shape_cast %6 : vector<1x1x9x9x4xbf16> to vector<9x9x4xbf16>
    %cst = arith.constant 0.000000e+00 : f32
    %8 = vector.broadcast %cst : f32 to vector<64x4xf32>
    %9 = vector.extract_strided_slice %1 {offsets = [0, 0, 0], sizes = [8, 8, 4], strides = [1, 1, 1]} : vector<9x9x4xbf16> to vector<8x8x4xbf16>
    %10 = vector.shape_cast %9 : vector<8x8x4xbf16> to vector<64x4xbf16>
    %c0_16 = arith.constant 0 : index
    %c0_17 = arith.constant 0 : index
    %c0_18 = arith.constant 0 : index
    %11 = vector.load %arg2[%c0_16, %c0_17, %c0_18] : memref<9x4x4xbf16, #tpu.memory_space<vmem>>, vector<1x4x4xbf16>
    %12 = vector.shape_cast %11 : vector<1x4x4xbf16> to vector<4x4xbf16>
    %cst_19 = arith.constant dense<0.000000e+00> : vector<64x4xf32>
    %13 = tpu.matmul %10, %12, %cst_19 {dimension_numbers = #tpu.dot_dimension_numbers<[1], [0], [0], [1], [0, 0, 1, 1], [], []>} : vector<64x4xbf16>, vector<4x4xbf16>, vector<64x4xf32> -> vector<64x4xf32>
    %14 = arith.addf %8, %13 : vector<64x4xf32>
    %15 = vector.extract_strided_slice %3 {offsets = [0, 0, 0], sizes = [8, 8, 4], strides = [1, 1, 1]} : vector<9x9x4xbf16> to vector<8x8x4xbf16>
    %16 = vector.shape_cast %15 : vector<8x8x4xbf16> to vector<64x4xbf16>
    %c1_20 = arith.constant 1 : index
    %c0_21 = arith.constant 0 : index
    %c0_22 = arith.constant 0 : index
    %17 = vector.load %arg2[%c1_20, %c0_21, %c0_22] : memref<9x4x4xbf16, #tpu.memory_space<vmem>>, vector<1x4x4xbf16>
    %18 = vector.shape_cast %17 : vector<1x4x4xbf16> to vector<4x4xbf16>
    %cst_23 = arith.constant dense<0.000000e+00> : vector<64x4xf32>
    %19 = tpu.matmul %16, %18, %cst_23 {dimension_numbers = #tpu.dot_dimension_numbers<[1], [0], [0], [1], [0, 0, 1, 1], [], []>} : vector<64x4xbf16>, vector<4x4xbf16>, vector<64x4xf32> -> vector<64x4xf32>
    %20 = arith.addf %14, %19 : vector<64x4xf32>
    %21 = vector.extract_strided_slice %1 {offsets = [0, 1, 0], sizes = [8, 8, 4], strides = [1, 1, 1]} : vector<9x9x4xbf16> to vector<8x8x4xbf16>
    %22 = vector.shape_cast %21 : vector<8x8x4xbf16> to vector<64x4xbf16>
    %c2_24 = arith.constant 2 : index
    %c0_25 = arith.constant 0 : index
    %c0_26 = arith.constant 0 : index
    %23 = vector.load %arg2[%c2_24, %c0_25, %c0_26] : memref<9x4x4xbf16, #tpu.memory_space<vmem>>, vector<1x4x4xbf16>
    %24 = vector.shape_cast %23 : vector<1x4x4xbf16> to vector<4x4xbf16>
    %cst_27 = arith.constant dense<0.000000e+00> : vector<64x4xf32>
    %25 = tpu.matmul %22, %24, %cst_27 {dimension_numbers = #tpu.dot_dimension_numbers<[1], [0], [0], [1], [0, 0, 1, 1], [], []>} : vector<64x4xbf16>, vector<4x4xbf16>, vector<64x4xf32> -> vector<64x4xf32>
    %26 = arith.addf %20, %25 : vector<64x4xf32>
    %27 = vector.extract_strided_slice %5 {offsets = [0, 0, 0], sizes = [8, 8, 4], strides = [1, 1, 1]} : vector<9x9x4xbf16> to vector<8x8x4xbf16>
    %28 = vector.shape_cast %27 : vector<8x8x4xbf16> to vector<64x4xbf16>
    %c3_28 = arith.constant 3 : index
    %c0_29 = arith.constant 0 : index
    %c0_30 = arith.constant 0 : index
    %29 = vector.load %arg2[%c3_28, %c0_29, %c0_30] : memref<9x4x4xbf16, #tpu.memory_space<vmem>>, vector<1x4x4xbf16>
    %30 = vector.shape_cast %29 : vector<1x4x4xbf16> to vector<4x4xbf16>
    %cst_31 = arith.constant dense<0.000000e+00> : vector<64x4xf32>
    %31 = tpu.matmul %28, %30, %cst_31 {dimension_numbers = #tpu.dot_dimension_numbers<[1], [0], [0], [1], [0, 0, 1, 1], [], []>} : vector<64x4xbf16>, vector<4x4xbf16>, vector<64x4xf32> -> vector<64x4xf32>
    %32 = arith.addf %26, %31 : vector<64x4xf32>
    %33 = vector.extract_strided_slice %7 {offsets = [0, 0, 0], sizes = [8, 8, 4], strides = [1, 1, 1]} : vector<9x9x4xbf16> to vector<8x8x4xbf16>
    %34 = vector.shape_cast %33 : vector<8x8x4xbf16> to vector<64x4xbf16>
    %c4 = arith.constant 4 : index
    %c0_32 = arith.constant 0 : index
    %c0_33 = arith.constant 0 : index
    %35 = vector.load %arg2[%c4, %c0_32, %c0_33] : memref<9x4x4xbf16, #tpu.memory_space<vmem>>, vector<1x4x4xbf16>
    %36 = vector.shape_cast %35 : vector<1x4x4xbf16> to vector<4x4xbf16>
    %cst_34 = arith.constant dense<0.000000e+00> : vector<64x4xf32>
    %37 = tpu.matmul %34, %36, %cst_34 {dimension_numbers = #tpu.dot_dimension_numbers<[1], [0], [0], [1], [0, 0, 1, 1], [], []>} : vector<64x4xbf16>, vector<4x4xbf16>, vector<64x4xf32> -> vector<64x4xf32>
    %38 = arith.addf %32, %37 : vector<64x4xf32>
    %39 = vector.extract_strided_slice %5 {offsets = [0, 1, 0], sizes = [8, 8, 4], strides = [1, 1, 1]} : vector<9x9x4xbf16> to vector<8x8x4xbf16>
    %40 = vector.shape_cast %39 : vector<8x8x4xbf16> to vector<64x4xbf16>
    %c5 = arith.constant 5 : index
    %c0_35 = arith.constant 0 : index
    %c0_36 = arith.constant 0 : index
    %41 = vector.load %arg2[%c5, %c0_35, %c0_36] : memref<9x4x4xbf16, #tpu.memory_space<vmem>>, vector<1x4x4xbf16>
    %42 = vector.shape_cast %41 : vector<1x4x4xbf16> to vector<4x4xbf16>
    %cst_37 = arith.constant dense<0.000000e+00> : vector<64x4xf32>
    %43 = tpu.matmul %40, %42, %cst_37 {dimension_numbers = #tpu.dot_dimension_numbers<[1], [0], [0], [1], [0, 0, 1, 1], [], []>} : vector<64x4xbf16>, vector<4x4xbf16>, vector<64x4xf32> -> vector<64x4xf32>
    %44 = arith.addf %38, %43 : vector<64x4xf32>
    %45 = vector.extract_strided_slice %1 {offsets = [1, 0, 0], sizes = [8, 8, 4], strides = [1, 1, 1]} : vector<9x9x4xbf16> to vector<8x8x4xbf16>
    %46 = vector.shape_cast %45 : vector<8x8x4xbf16> to vector<64x4xbf16>
    %c6 = arith.constant 6 : index
    %c0_38 = arith.constant 0 : index
    %c0_39 = arith.constant 0 : index
    %47 = vector.load %arg2[%c6, %c0_38, %c0_39] : memref<9x4x4xbf16, #tpu.memory_space<vmem>>, vector<1x4x4xbf16>
    %48 = vector.shape_cast %47 : vector<1x4x4xbf16> to vector<4x4xbf16>
    %cst_40 = arith.constant dense<0.000000e+00> : vector<64x4xf32>
    %49 = tpu.matmul %46, %48, %cst_40 {dimension_numbers = #tpu.dot_dimension_numbers<[1], [0], [0], [1], [0, 0, 1, 1], [], []>} : vector<64x4xbf16>, vector<4x4xbf16>, vector<64x4xf32> -> vector<64x4xf32>
    %50 = arith.addf %44, %49 : vector<64x4xf32>
    %51 = vector.extract_strided_slice %3 {offsets = [1, 0, 0], sizes = [8, 8, 4], strides = [1, 1, 1]} : vector<9x9x4xbf16> to vector<8x8x4xbf16>
    %52 = vector.shape_cast %51 : vector<8x8x4xbf16> to vector<64x4xbf16>
    %c7 = arith.constant 7 : index
    %c0_41 = arith.constant 0 : index
    %c0_42 = arith.constant 0 : index
    %53 = vector.load %arg2[%c7, %c0_41, %c0_42] : memref<9x4x4xbf16, #tpu.memory_space<vmem>>, vector<1x4x4xbf16>
    %54 = vector.shape_cast %53 : vector<1x4x4xbf16> to vector<4x4xbf16>
    %cst_43 = arith.constant dense<0.000000e+00> : vector<64x4xf32>
    %55 = tpu.matmul %52, %54, %cst_43 {dimension_numbers = #tpu.dot_dimension_numbers<[1], [0], [0], [1], [0, 0, 1, 1], [], []>} : vector<64x4xbf16>, vector<4x4xbf16>, vector<64x4xf32> -> vector<64x4xf32>
    %56 = arith.addf %50, %55 : vector<64x4xf32>
    %57 = vector.extract_strided_slice %1 {offsets = [1, 1, 0], sizes = [8, 8, 4], strides = [1, 1, 1]} : vector<9x9x4xbf16> to vector<8x8x4xbf16>
    %58 = vector.shape_cast %57 : vector<8x8x4xbf16> to vector<64x4xbf16>
    %c8 = arith.constant 8 : index
    %c0_44 = arith.constant 0 : index
    %c0_45 = arith.constant 0 : index
    %59 = vector.load %arg2[%c8, %c0_44, %c0_45] : memref<9x4x4xbf16, #tpu.memory_space<vmem>>, vector<1x4x4xbf16>
    %60 = vector.shape_cast %59 : vector<1x4x4xbf16> to vector<4x4xbf16>
    %cst_46 = arith.constant dense<0.000000e+00> : vector<64x4xf32>
    %61 = tpu.matmul %58, %60, %cst_46 {dimension_numbers = #tpu.dot_dimension_numbers<[1], [0], [0], [1], [0, 0, 1, 1], [], []>} : vector<64x4xbf16>, vector<4x4xbf16>, vector<64x4xf32> -> vector<64x4xf32>
    %62 = arith.addf %56, %61 : vector<64x4xf32>
    %c0_47 = arith.constant 0 : index
    %c0_48 = arith.constant 0 : index
    %63 = vector.load %arg3[%c0_47, %c0_48] : memref<1x4xf32, #tpu.memory_space<vmem>>, vector<1x4xf32>
    %64 = vector.broadcast %63 : vector<1x4xf32> to vector<64x4xf32>
    %65 = arith.mulf %62, %64 : vector<64x4xf32>
    %c0_49 = arith.constant 0 : index
    %c0_50 = arith.constant 0 : index
    %66 = vector.load %arg4[%c0_49, %c0_50] : memref<1x4xf32, #tpu.memory_space<vmem>>, vector<1x4xf32>
    %67 = vector.broadcast %66 : vector<1x4xf32> to vector<64x4xf32>
    %68 = arith.addf %65, %67 : vector<64x4xf32>
    %cst_51 = arith.constant 0.000000e+00 : f32
    %69 = vector.broadcast %cst_51 : f32 to vector<64x4xf32>
    %70 = arith.maximumf %68, %69 : vector<64x4xf32>
    %71 = arith.truncf %70 : vector<64x4xf32> to vector<64x4xbf16>
    %c0_52 = arith.constant 0 : index
    %c0_53 = arith.constant 0 : index
    %c0_54 = arith.constant 0 : index
    %72 = vector.load %arg5[%c0_52, %c0_53, %c0_54] : memref<1x64x4xbf16, #tpu.memory_space<vmem>>, vector<1x64x4xbf16>
    %73 = vector.shape_cast %72 : vector<1x64x4xbf16> to vector<64x4xbf16>
    %74 = vector.shape_cast %71 : vector<64x4xbf16> to vector<1x64x4xbf16>
    tpu.vector_store %arg5[%c0_52, %c0_53, %c0_54], %74 {strides = array<i32>} : memref<1x64x4xbf16, #tpu.memory_space<vmem>>, vector<1x64x4xbf16>,
    return
  }
  func.func @transform_0(%arg0: i32) -> (i32, i32, i32, i32, i32) {
    %c0_i32 = arith.constant 0 : i32
    %c0_i32_0 = arith.constant 0 : i32
    %c0_i32_1 = arith.constant 0 : i32
    %c0_i32_2 = arith.constant 0 : i32
    %c0_i32_3 = arith.constant 0 : i32
    return %arg0, %c0_i32, %c0_i32_0, %c0_i32_1, %c0_i32_2 : i32, i32, i32, i32, i32
  }
  func.func @transform_1(%arg0: i32) -> (i32, i32, i32) {
    %c0_i32 = arith.constant 0 : i32
    %c0_i32_0 = arith.constant 0 : i32
    %c0_i32_1 = arith.constant 0 : i32
    %c0_i32_2 = arith.constant 0 : i32
    return %c0_i32, %c0_i32_0, %c0_i32_1 : i32, i32, i32
  }
  func.func @transform_2(%arg0: i32) -> (i32, i32) {
    %c0_i32 = arith.constant 0 : i32
    %c0_i32_0 = arith.constant 0 : i32
    %c0_i32_1 = arith.constant 0 : i32
    return %c0_i32, %c0_i32_0 : i32, i32
  }
  func.func @transform_3(%arg0: i32) -> (i32, i32) {
    %c0_i32 = arith.constant 0 : i32
    %c0_i32_0 = arith.constant 0 : i32
    %c0_i32_1 = arith.constant 0 : i32
    return %c0_i32, %c0_i32_0 : i32, i32
  }
  func.func @transform_4(%arg0: i32) -> (i32, i32, i32) {
    %c0_i32 = arith.constant 0 : i32
    %c0_i32_0 = arith.constant 0 : i32
    %c0_i32_1 = arith.constant 0 : i32
    return %arg0, %c0_i32, %c0_i32_0 : i32, i32, i32
  }
}

module attributes {stable_mosaic.version = 11 : i64} {
  func.func @_conv3_ds_add_relu_kernel(%arg0: i32, %arg1: memref<128x4xbf16, #tpu.memory_space<vmem>>, %arg2: memref<128x8xbf16, #tpu.memory_space<vmem>>, %arg3: memref<4x16xbf16, #tpu.memory_space<vmem>>, %arg4: memref<8x16xbf16, #tpu.memory_space<vmem>>, %arg5: memref<1x16xf32, #tpu.memory_space<vmem>>, %arg6: memref<1x16xf32, #tpu.memory_space<vmem>>, %arg7: memref<1x16xf32, #tpu.memory_space<vmem>>, %arg8: memref<1x16xf32, #tpu.memory_space<vmem>>, %arg9: memref<128x16xf32, #tpu.memory_space<vmem>>) attributes {dimension_semantics = [#tpu.dimension_semantics<parallel>], iteration_bounds = array<i64: 1>, scalar_prefetch = 0 : i64, scratch_operands = 0 : i64, tpu.core_type = #tpu.core_type<tc>, window_params = [{transform_indices = @transform_0, window_bounds = array<i64: 128, 4>}, {transform_indices = @transform_1, window_bounds = array<i64: 128, 8>}, {pipeline_mode = #tpu.pipeline_mode<synchronous>, transform_indices = @transform_2, window_bounds = array<i64: 4, 16>}, {pipeline_mode = #tpu.pipeline_mode<synchronous>, transform_indices = @transform_3, window_bounds = array<i64: 8, 16>}, {pipeline_mode = #tpu.pipeline_mode<synchronous>, transform_indices = @transform_4, window_bounds = array<i64: 1, 16>}, {pipeline_mode = #tpu.pipeline_mode<synchronous>, transform_indices = @transform_5, window_bounds = array<i64: 1, 16>}, {pipeline_mode = #tpu.pipeline_mode<synchronous>, transform_indices = @transform_6, window_bounds = array<i64: 1, 16>}, {pipeline_mode = #tpu.pipeline_mode<synchronous>, transform_indices = @transform_7, window_bounds = array<i64: 1, 16>}, {transform_indices = @transform_8, window_bounds = array<i64: 128, 16>}]} {
    %c0 = arith.constant 0 : index
    %c0_0 = arith.constant 0 : index
    %0 = vector.load %arg1[%c0, %c0_0] : memref<128x4xbf16, #tpu.memory_space<vmem>>, vector<128x4xbf16>
    %c0_1 = arith.constant 0 : index
    %c0_2 = arith.constant 0 : index
    %1 = vector.load %arg3[%c0_1, %c0_2] : memref<4x16xbf16, #tpu.memory_space<vmem>>, vector<4x16xbf16>
    %cst = arith.constant dense<0.000000e+00> : vector<128x16xf32>
    %2 = tpu.matmul %0, %1, %cst {dimension_numbers = #tpu.dot_dimension_numbers<[1], [0], [0], [1], [0, 0, 1, 1], [], []>} : vector<128x4xbf16>, vector<4x16xbf16>, vector<128x16xf32> -> vector<128x16xf32>
    %c0_3 = arith.constant 0 : index
    %c0_4 = arith.constant 0 : index
    %3 = vector.load %arg2[%c0_3, %c0_4] : memref<128x8xbf16, #tpu.memory_space<vmem>>, vector<128x8xbf16>
    %c0_5 = arith.constant 0 : index
    %c0_6 = arith.constant 0 : index
    %4 = vector.load %arg4[%c0_5, %c0_6] : memref<8x16xbf16, #tpu.memory_space<vmem>>, vector<8x16xbf16>
    %cst_7 = arith.constant dense<0.000000e+00> : vector<128x16xf32>
    %5 = tpu.matmul %3, %4, %cst_7 {dimension_numbers = #tpu.dot_dimension_numbers<[1], [0], [0], [1], [0, 0, 1, 1], [], []>} : vector<128x8xbf16>, vector<8x16xbf16>, vector<128x16xf32> -> vector<128x16xf32>
    %c0_8 = arith.constant 0 : index
    %c0_9 = arith.constant 0 : index
    %6 = vector.load %arg5[%c0_8, %c0_9] : memref<1x16xf32, #tpu.memory_space<vmem>>, vector<1x16xf32>
    %7 = vector.broadcast %6 : vector<1x16xf32> to vector<128x16xf32>
    %8 = arith.mulf %2, %7 : vector<128x16xf32>
    %c0_10 = arith.constant 0 : index
    %c0_11 = arith.constant 0 : index
    %9 = vector.load %arg6[%c0_10, %c0_11] : memref<1x16xf32, #tpu.memory_space<vmem>>, vector<1x16xf32>
    %10 = vector.broadcast %9 : vector<1x16xf32> to vector<128x16xf32>
    %11 = arith.addf %8, %10 : vector<128x16xf32>
    %c0_12 = arith.constant 0 : index
    %c0_13 = arith.constant 0 : index
    %12 = vector.load %arg7[%c0_12, %c0_13] : memref<1x16xf32, #tpu.memory_space<vmem>>, vector<1x16xf32>
    %13 = vector.broadcast %12 : vector<1x16xf32> to vector<128x16xf32>
    %14 = arith.mulf %5, %13 : vector<128x16xf32>
    %c0_14 = arith.constant 0 : index
    %c0_15 = arith.constant 0 : index
    %15 = vector.load %arg8[%c0_14, %c0_15] : memref<1x16xf32, #tpu.memory_space<vmem>>, vector<1x16xf32>
    %16 = vector.broadcast %15 : vector<1x16xf32> to vector<128x16xf32>
    %17 = arith.addf %14, %16 : vector<128x16xf32>
    %18 = arith.addf %11, %17 : vector<128x16xf32>
    %cst_16 = arith.constant 0.000000e+00 : f32
    %19 = vector.broadcast %cst_16 : f32 to vector<128x16xf32>
    %20 = arith.maximumf %18, %19 : vector<128x16xf32>
    %c0_17 = arith.constant 0 : index
    %c0_18 = arith.constant 0 : index
    %21 = vector.load %arg9[%c0_17, %c0_18] : memref<128x16xf32, #tpu.memory_space<vmem>>, vector<128x16xf32>
    tpu.vector_store %arg9[%c0_17, %c0_18], %20 {strides = array<i32>} : memref<128x16xf32, #tpu.memory_space<vmem>>, vector<128x16xf32>,
    return
  }
  func.func @transform_0(%arg0: i32) -> (i32, i32) {
    %c0_i32 = arith.constant 0 : i32
    %c0_i32_0 = arith.constant 0 : i32
    return %arg0, %c0_i32 : i32, i32
  }
  func.func @transform_1(%arg0: i32) -> (i32, i32) {
    %c0_i32 = arith.constant 0 : i32
    %c0_i32_0 = arith.constant 0 : i32
    return %arg0, %c0_i32 : i32, i32
  }
  func.func @transform_2(%arg0: i32) -> (i32, i32) {
    %c0_i32 = arith.constant 0 : i32
    %c0_i32_0 = arith.constant 0 : i32
    %c0_i32_1 = arith.constant 0 : i32
    return %c0_i32, %c0_i32_0 : i32, i32
  }
  func.func @transform_3(%arg0: i32) -> (i32, i32) {
    %c0_i32 = arith.constant 0 : i32
    %c0_i32_0 = arith.constant 0 : i32
    %c0_i32_1 = arith.constant 0 : i32
    return %c0_i32, %c0_i32_0 : i32, i32
  }
  func.func @transform_4(%arg0: i32) -> (i32, i32) {
    %c0_i32 = arith.constant 0 : i32
    %c0_i32_0 = arith.constant 0 : i32
    %c0_i32_1 = arith.constant 0 : i32
    return %c0_i32, %c0_i32_0 : i32, i32
  }
  func.func @transform_5(%arg0: i32) -> (i32, i32) {
    %c0_i32 = arith.constant 0 : i32
    %c0_i32_0 = arith.constant 0 : i32
    %c0_i32_1 = arith.constant 0 : i32
    return %c0_i32, %c0_i32_0 : i32, i32
  }
  func.func @transform_6(%arg0: i32) -> (i32, i32) {
    %c0_i32 = arith.constant 0 : i32
    %c0_i32_0 = arith.constant 0 : i32
    %c0_i32_1 = arith.constant 0 : i32
    return %c0_i32, %c0_i32_0 : i32, i32
  }
  func.func @transform_7(%arg0: i32) -> (i32, i32) {
    %c0_i32 = arith.constant 0 : i32
    %c0_i32_0 = arith.constant 0 : i32
    %c0_i32_1 = arith.constant 0 : i32
    return %c0_i32, %c0_i32_0 : i32, i32
  }
  func.func @transform_8(%arg0: i32) -> (i32, i32) {
    %c0_i32 = arith.constant 0 : i32
    %c0_i32_0 = arith.constant 0 : i32
    return %arg0, %c0_i32 : i32, i32
  }
}

</mosaic_0001>

<bundles_post_ra>
// kernel: bottleneck_forward.3
= control target key start
LH: loop header
LB: loop body
LE: loop exit
PB: predicated region body
PF: predicated region fallthrough
CT: control target
= control target key end

     0   :  { %s1077_s15 = smov 0   ;;  %s1278_s0 = inlined_call_operand.vmem [shape: bf16[512,8], index: 0, kind: input, shape index: {}]   ;;  %s1279_s1 = inlined_call_operand.vmem [shape: bf16[8,4], index: 1, kind: input, shape index: {}]   ;;  %s1280_s2 = inlined_call_operand.vmem [shape: f32[1,4], index: 2, kind: input, shape index: {}]   ;;  %s1281_s3 = inlined_call_operand.vmem [shape: f32[1,4], index: 3, kind: input, shape index: {}]   ;;  %s1282_s4 = inlined_call_operand.vmem [shape: bf16[512,4], index: 4, kind: output, shape index: {}]  }
   0x1 LB: > { %s856_s16 = sadd.s32 4294967295, %s1050_s15   ;;  %p860_p0 = scmp.ge.s32.totalorder %s1050_s15, 1  ;;  %s1050_s15 = sphi %s1077_s15, %s14_s15  }
   0x2   : > { %p163_p1 = scmp.lt.s32.totalorder %s1050_s15, 3 }
   0x4   : > { %p164_p2 = pnand %p860_p0, %p163_p1 }
   0x5   : > { %s861_s19 = sshll.u32 (!%p164_p2), %s856_s16, 5 }
   0x6   : > { %167 = sbr.rel (%p164_p2) target bundleno = 249 (0xf9), region = 36  ;;  %p190_p3 = scmp.lt.s32.totalorder (!%p164_p2), %s861_s19, 63 }
   0xb   : > { %v234_v0 = vld [vmem:[%s1279_s1] sm:$0xf]  ;;  %vm364_vm0 = vcmask 1043456   ;;  %s1284_s19 = smov (!%p190_p3, %s861_s19), 63  ;;  %vm315_vm1 = vcmask 64512   ;;  %vm767_vm2 = vcmask 27648  }
   0xc   : > { %1018 = vmatprep.subr.msk.bf16.mxu0 %vm364_vm0, %v234_v0  ;;  %1019 = vmatprep.subr.msk.bf16.mxu1 %vm364_vm0, %v234_v0  ;;  %v366_v1 = vsel %vm364_vm0, %v234_v0, 0  ;;  %s862_s20 = sshll.u32 %s1284_s19, 2  ;;  %v1133_v18 = vld [vmem:[%s1280_s2] ss:$0 sm:$0xff] }
   0xd   : > { %983 = vmatpush3.bf16.msra.mxu0 %v366_v1  ;;  %1017 = vmatpush3.bf16.msra.mxu1 %v366_v1  ;;  %s1096_s23 = scalar_lea.vmem %s1278_s0, %s862_s20  ;;  %v1138_v20 = vld [vmem:[%s1281_s3] ss:$0 sm:$0xff]  ;;  %s1153_s30 = scalar_lea.vmem %s1282_s4, %s862_s20 }
   0xe   : > { %v1028_v2 = vld [vmem:[%s1096_s23] sm:$0xff]   ;;  %v1030_v4 = vld [vmem:[%s1096_s23 + $0x8] sm:$0xff]   ;;  %v1032_v6 = vld [vmem:[%s1096_s23 + $0x10] sm:$0xff]  }
   0xf   : > { %v1029_v3 = vld [vmem:[%s1096_s23 + $0x40] sm:$0xff]   ;;  %984 = vmatprep.mubr.msk.bf16.mxu0 %vm315_vm1, %v1028_v2  ;;  %v1031_v5 = vld [vmem:[%s1096_s23 + $0x48] sm:$0xff]   ;;  %v1033_v7 = vld [vmem:[%s1096_s23 + $0x50] sm:$0xff]  }
  0x10   : > { %1000 = vmatprep.mubr.msk.bf16.mxu1 %vm315_vm1, %v1029_v3  ;;  %985 = vmatmul.mubr.msk.bf16.vlgmr.msra.gmra.mxu0 %vm315_vm1, %v1030_v4  ;;  %v1034_v8 = vld [vmem:[%s1096_s23 + $0x18] sm:$0xff]   ;;  %v1036_v10 = vld [vmem:[%s1096_s23 + $0x20] sm:$0xff]   ;;  %v1038_v12 = vld [vmem:[%s1096_s23 + $0x28] sm:$0xff]  }
  0x11   : > { %1001 = vmatmul.mubr.msk.bf16.vlgmr.msra.gmra.mxu1 %vm315_vm1, %v1031_v5  ;;  %988 = vmatprep.mubr.msk.bf16.mxu0 %vm315_vm1, %v1032_v6  ;;  %v1035_v9 = vld [vmem:[%s1096_s23 + $0x58] sm:$0xff]   ;;  %v1037_v11 = vld [vmem:[%s1096_s23 + $0x60] sm:$0xff]   ;;  %v1039_v13 = vld [vmem:[%s1096_s23 + $0x68] sm:$0xff]  }
  0x12   : > { %1004 = vmatprep.mubr.msk.bf16.mxu1 %vm315_vm1, %v1033_v7  ;;  %v1040_v14 = vld [vmem:[%s1096_s23 + $0x30] sm:$0xff]   ;;  %v1042_v16 = vld [vmem:[%s1096_s23 + $0x38] sm:$0xff]  }
  0x13   : > { %v1041_v15 = vld [vmem:[%s1096_s23 + $0x70] sm:$0xff]   ;;  %v1043_v17 = vld [vmem:[%s1096_s23 + $0x78] sm:$0xff]  }
  0x18   : > { %989 = vmatmul.mubr.msk.bf16.gmra.mxu0 %vm315_vm1, %v1034_v8 }
  0x19   : > { %1005 = vmatmul.mubr.msk.bf16.gmra.mxu1 %vm315_vm1, %v1035_v9  ;;  %992 = vmatprep.mubr.msk.bf16.mxu0 %vm315_vm1, %v1036_v10 }
  0x1a   : > { %1008 = vmatprep.mubr.msk.bf16.mxu1 %vm315_vm1, %v1037_v11 }
  0x20   : > { %993 = vmatmul.mubr.msk.bf16.gmra.mxu0 %vm315_vm1, %v1038_v12 }
  0x21   : > { %1009 = vmatmul.mubr.msk.bf16.gmra.mxu1 %vm315_vm1, %v1039_v13  ;;  %996 = vmatprep.mubr.msk.bf16.mxu0 %vm315_vm1, %v1040_v14 }
  0x22   : > { %1012 = vmatprep.mubr.msk.bf16.mxu1 %vm315_vm1, %v1041_v15 }
  0x28   : > { %997 = vmatmul.mubr.msk.bf16.gmra.mxu0 %vm315_vm1, %v1042_v16 }
  0x29   : > { %1013 = vmatmul.mubr.msk.bf16.gmra.mxu1 %vm315_vm1, %v1043_v17 }
  0xd0   : > { %v986_v19 = vpop.f32.mrf.mxu0 }
  0xd1   : > { %v538_v21 = vmul.f32 %v986_v19, %v1133_v18  ;;  %v1002_v22 = vpop.f32.mrf.mxu1 }
  0xd2   : > { %v554_v23 = vmul.f32 %v1002_v22, %v1133_v18  ;;  %v402_v24 = vpop.f32.mrf.mxu0 }
  0xd3   : > { %v577_v25 = vadd.f32 %v1138_v20, %v538_v21  ;;  %v536_v26 = vmul.f32 %v1133_v18, %v402_v24  ;;  %v466_v27 = vpop.f32.mrf.mxu1 }
  0xd4   : > { %v593_v28 = vadd.f32 %v1138_v20, %v554_v23  ;;  %v552_v29 = vmul.f32 %v1133_v18, %v466_v27  ;;  %v987_v30 = vpop.f32.mrf.mxu0 }
  0xd5   : > { %v609_v31 = vmax.f32 %v577_v25, 0.0  ;;  %v575_v32 = vadd.f32 %v1138_v20, %v536_v26  ;;  %v539_v33 = vmul.f32 %v987_v30, %v1133_v18  ;;  %v1003_v34 = vpop.f32.mrf.mxu1 }
  0xd6   : > { %v625_v35 = vmax.f32 %v593_v28, 0.0  ;;  %v591_v36 = vadd.f32 %v1138_v20, %v552_v29  ;;  %v555_v37 = vmul.f32 %v1003_v34, %v1133_v18  ;;  %v405_v38 = vpop.f32.mrf.mxu0 }
  0xd7   : > { %v935_v39 = vpack.c.bf16 %v609_v31, %v609_v31  ;;  %v607_v40 = vmax.f32 %v575_v32, 0.0  ;;  %v578_v41 = vadd.f32 %v1138_v20, %v539_v33  ;;  %v537_v42 = vmul.f32 %v1133_v18, %v405_v38  ;;  %v469_v43 = vpop.f32.mrf.mxu1 }
  0xd8   : > { %v951_v44 = vpack.c.bf16 %v625_v35, %v625_v35  ;;  %v623_v45 = vmax.f32 %v591_v36, 0.0  ;;  %v594_v46 = vadd.f32 %v1138_v20, %v555_v37  ;;  %v553_v47 = vmul.f32 %v1133_v18, %v469_v43  ;;  %v990_v48 = vpop.f32.mrf.mxu0 }
  0xd9   : > { %770 = vst.msk [vmem:[%s1153_s30 + $0x8] sm:$0xf] %vm767_vm2, %v935_v39  ;;  %v933_v49 = vpack.c.bf16 %v607_v40, %v607_v40  ;;  %v610_v50 = vmax.f32 %v578_v41, 0.0  ;;  %v576_v51 = vadd.f32 %v1138_v20, %v537_v42  ;;  %v542_v52 = vmul.f32 %v990_v48, %v1133_v18  ;;  %v1006_v53 = vpop.f32.mrf.mxu1 }
  0xda   : > { %786 = vst.msk [vmem:[%s1153_s30 + $0x48] sm:$0xf] %vm767_vm2, %v951_v44  ;;  %v949_v54 = vpack.c.bf16 %v623_v45, %v623_v45  ;;  %v626_v55 = vmax.f32 %v594_v46, 0.0  ;;  %v592_v56 = vadd.f32 %v1138_v20, %v553_v47  ;;  %v558_v57 = vmul.f32 %v1006_v53, %v1133_v18  ;;  %v418_v58 = vpop.f32.mrf.mxu0 }
  0xdb   : > { %768 = vst.msk [vmem:[%s1153_s30] sm:$0xf] %vm767_vm2, %v933_v49  ;;  %v936_v59 = vpack.c.bf16 %v610_v50, %v610_v50  ;;  %v608_v60 = vmax.f32 %v576_v51, 0.0  ;;  %v581_v61 = vadd.f32 %v1138_v20, %v542_v52  ;;  %v540_v62 = vmul.f32 %v1133_v18, %v418_v58  ;;  %v482_v63 = vpop.f32.mrf.mxu1 }
  0xdc   : > { %784 = vst.msk [vmem:[%s1153_s30 + $0x40] sm:$0xf] %vm767_vm2, %v949_v54  ;;  %v952_v0 = vpack.c.bf16 %v626_v55, %v626_v55  ;;  %v624_v1 = vmax.f32 %v592_v56, 0.0  ;;  %v597_v2 = vadd.f32 %v1138_v20, %v558_v57  ;;  %v556_v3 = vmul.f32 %v1133_v18, %v482_v63  ;;  %v991_v4 = vpop.f32.mrf.mxu0 }
  0xdd   : > { %771 = vst.msk [vmem:[%s1153_s30 + $0xc] sm:$0xf] %vm767_vm2, %v936_v59  ;;  %v934_v5 = vpack.c.bf16 %v608_v60, %v608_v60  ;;  %v613_v6 = vmax.f32 %v581_v61, 0.0  ;;  %v579_v7 = vadd.f32 %v1138_v20, %v540_v62  ;;  %v543_v8 = vmul.f32 %v991_v4, %v1133_v18  ;;  %v1007_v9 = vpop.f32.mrf.mxu1 }
  0xde   : > { %787 = vst.msk [vmem:[%s1153_s30 + $0x4c] sm:$0xf] %vm767_vm2, %v952_v0  ;;  %v950_v10 = vpack.c.bf16 %v624_v1, %v624_v1  ;;  %v629_v11 = vmax.f32 %v597_v2, 0.0  ;;  %v595_v12 = vadd.f32 %v1138_v20, %v556_v3  ;;  %v559_v13 = vmul.f32 %v1007_v9, %v1133_v18  ;;  %v421_v14 = vpop.f32.mrf.mxu0 }
  0xdf   : > { %769 = vst.msk [vmem:[%s1153_s30 + $0x4] sm:$0xf] %vm767_vm2, %v934_v5  ;;  %v939_v15 = vpack.c.bf16 %v613_v6, %v613_v6  ;;  %v611_v16 = vmax.f32 %v579_v7, 0.0  ;;  %v582_v17 = vadd.f32 %v1138_v20, %v543_v8  ;;  %v541_v19 = vmul.f32 %v1133_v18, %v421_v14  ;;  %v485_v21 = vpop.f32.mrf.mxu1 }
  0xe0   : > { %785 = vst.msk [vmem:[%s1153_s30 + $0x44] sm:$0xf] %vm767_vm2, %v950_v10  ;;  %v955_v22 = vpack.c.bf16 %v629_v11, %v629_v11  ;;  %v627_v23 = vmax.f32 %v595_v12, 0.0  ;;  %v598_v24 = vadd.f32 %v1138_v20, %v559_v13  ;;  %v557_v25 = vmul.f32 %v1133_v18, %v485_v21  ;;  %v994_v26 = vpop.f32.mrf.mxu0 }
  0xe1   : > { %774 = vst.msk [vmem:[%s1153_s30 + $0x18] sm:$0xf] %vm767_vm2, %v939_v15  ;;  %v937_v27 = vpack.c.bf16 %v611_v16, %v611_v16  ;;  %v614_v28 = vmax.f32 %v582_v17, 0.0  ;;  %v580_v29 = vadd.f32 %v1138_v20, %v541_v19  ;;  %v546_v30 = vmul.f32 %v994_v26, %v1133_v18  ;;  %v1010_v31 = vpop.f32.mrf.mxu1 }
  0xe2   : > { %790 = vst.msk [vmem:[%s1153_s30 + $0x58] sm:$0xf] %vm767_vm2, %v955_v22  ;;  %v953_v32 = vpack.c.bf16 %v627_v23, %v627_v23  ;;  %v630_v33 = vmax.f32 %v598_v24, 0.0  ;;  %v596_v34 = vadd.f32 %v1138_v20, %v557_v25  ;;  %v562_v35 = vmul.f32 %v1010_v31, %v1133_v18  ;;  %v434_v36 = vpop.f32.mrf.mxu0 }
  0xe3   : > { %772 = vst.msk [vmem:[%s1153_s30 + $0x10] sm:$0xf] %vm767_vm2, %v937_v27  ;;  %v940_v37 = vpack.c.bf16 %v614_v28, %v614_v28  ;;  %v612_v38 = vmax.f32 %v580_v29, 0.0  ;;  %v585_v39 = vadd.f32 %v1138_v20, %v546_v30  ;;  %v544_v40 = vmul.f32 %v1133_v18, %v434_v36  ;;  %v498_v41 = vpop.f32.mrf.mxu1 }
  0xe4   : > { %788 = vst.msk [vmem:[%s1153_s30 + $0x50] sm:$0xf] %vm767_vm2, %v953_v32  ;;  %v956_v42 = vpack.c.bf16 %v630_v33, %v630_v33  ;;  %v628_v43 = vmax.f32 %v596_v34, 0.0  ;;  %v601_v44 = vadd.f32 %v1138_v20, %v562_v35  ;;  %v560_v45 = vmul.f32 %v1133_v18, %v498_v41  ;;  %v995_v46 = vpop.f32.mrf.mxu0 }
  0xe5   : > { %775 = vst.msk [vmem:[%s1153_s30 + $0x1c] sm:$0xf] %vm767_vm2, %v940_v37  ;;  %v938_v47 = vpack.c.bf16 %v612_v38, %v612_v38  ;;  %v617_v48 = vmax.f32 %v585_v39, 0.0  ;;  %v583_v49 = vadd.f32 %v1138_v20, %v544_v40  ;;  %v547_v50 = vmul.f32 %v995_v46, %v1133_v18  ;;  %v1011_v51 = vpop.f32.mrf.mxu1 }
  0xe6   : > { %791 = vst.msk [vmem:[%s1153_s30 + $0x5c] sm:$0xf] %vm767_vm2, %v956_v42  ;;  %v954_v52 = vpack.c.bf16 %v628_v43, %v628_v43  ;;  %v633_v53 = vmax.f32 %v601_v44, 0.0  ;;  %v599_v54 = vadd.f32 %v1138_v20, %v560_v45  ;;  %v563_v55 = vmul.f32 %v1011_v51, %v1133_v18  ;;  %v437_v56 = vpop.f32.mrf.mxu0 }
  0xe7   : > { %773 = vst.msk [vmem:[%s1153_s30 + $0x14] sm:$0xf] %vm767_vm2, %v938_v47  ;;  %v943_v57 = vpack.c.bf16 %v617_v48, %v617_v48  ;;  %v615_v58 = vmax.f32 %v583_v49, 0.0  ;;  %v586_v59 = vadd.f32 %v1138_v20, %v547_v50  ;;  %v545_v60 = vmul.f32 %v1133_v18, %v437_v56  ;;  %v501_v61 = vpop.f32.mrf.mxu1 }
  0xe8   : > { %789 = vst.msk [vmem:[%s1153_s30 + $0x54] sm:$0xf] %vm767_vm2, %v954_v52  ;;  %v959_v62 = vpack.c.bf16 %v633_v53, %v633_v53  ;;  %v631_v63 = vmax.f32 %v599_v54, 0.0  ;;  %v602_v0 = vadd.f32 %v1138_v20, %v563_v55  ;;  %v561_v1 = vmul.f32 %v1133_v18, %v501_v61  ;;  %v998_v2 = vpop.f32.mrf.mxu0 }
  0xe9   : > { %778 = vst.msk [vmem:[%s1153_s30 + $0x28] sm:$0xf] %vm767_vm2, %v943_v57  ;;  %v941_v3 = vpack.c.bf16 %v615_v58, %v615_v58  ;;  %v618_v4 = vmax.f32 %v586_v59, 0.0  ;;  %v584_v5 = vadd.f32 %v1138_v20, %v545_v60  ;;  %v550_v6 = vmul.f32 %v998_v2, %v1133_v18  ;;  %v1014_v7 = vpop.f32.mrf.mxu1 }
  0xea   : > { %794 = vst.msk [vmem:[%s1153_s30 + $0x68] sm:$0xf] %vm767_vm2, %v959_v62  ;;  %v957_v8 = vpack.c.bf16 %v631_v63, %v631_v63  ;;  %v634_v9 = vmax.f32 %v602_v0, 0.0  ;;  %v600_v10 = vadd.f32 %v1138_v20, %v561_v1  ;;  %v566_v11 = vmul.f32 %v1014_v7, %v1133_v18  ;;  %v450_v12 = vpop.f32.mrf.mxu0 }
  0xeb   : > { %776 = vst.msk [vmem:[%s1153_s30 + $0x20] sm:$0xf] %vm767_vm2, %v941_v3  ;;  %v944_v13 = vpack.c.bf16 %v618_v4, %v618_v4  ;;  %v616_v14 = vmax.f32 %v584_v5, 0.0  ;;  %v589_v15 = vadd.f32 %v1138_v20, %v550_v6  ;;  %v548_v16 = vmul.f32 %v1133_v18, %v450_v12  ;;  %v514_v17 = vpop.f32.mrf.mxu1 }
  0xec   : > { %792 = vst.msk [vmem:[%s1153_s30 + $0x60] sm:$0xf] %vm767_vm2, %v957_v8  ;;  %v960_v19 = vpack.c.bf16 %v634_v9, %v634_v9  ;;  %v632_v21 = vmax.f32 %v600_v10, 0.0  ;;  %v605_v22 = vadd.f32 %v1138_v20, %v566_v11  ;;  %v564_v23 = vmul.f32 %v1133_v18, %v514_v17  ;;  %v999_v24 = vpop.f32.mrf.mxu0 }
  0xed   : > { %779 = vst.msk [vmem:[%s1153_s30 + $0x2c] sm:$0xf] %vm767_vm2, %v944_v13  ;;  %v942_v25 = vpack.c.bf16 %v616_v14, %v616_v14  ;;  %v621_v26 = vmax.f32 %v589_v15, 0.0  ;;  %v587_v27 = vadd.f32 %v1138_v20, %v548_v16  ;;  %v551_v28 = vmul.f32 %v999_v24, %v1133_v18  ;;  %v1015_v29 = vpop.f32.mrf.mxu1 }
  0xee   : > { %795 = vst.msk [vmem:[%s1153_s30 + $0x6c] sm:$0xf] %vm767_vm2, %v960_v19  ;;  %v958_v30 = vpack.c.bf16 %v632_v21, %v632_v21  ;;  %v637_v31 = vmax.f32 %v605_v22, 0.0  ;;  %v603_v32 = vadd.f32 %v1138_v20, %v564_v23  ;;  %v567_v33 = vmul.f32 %v1015_v29, %v1133_v18  ;;  %v453_v34 = vpop.f32.mrf.mxu0 }
  0xef   : > { %777 = vst.msk [vmem:[%s1153_s30 + $0x24] sm:$0xf] %vm767_vm2, %v942_v25  ;;  %v947_v35 = vpack.c.bf16 %v621_v26, %v621_v26  ;;  %v619_v36 = vmax.f32 %v587_v27, 0.0  ;;  %v590_v37 = vadd.f32 %v1138_v20, %v551_v28  ;;  %v549_v38 = vmul.f32 %v1133_v18, %v453_v34  ;;  %v517_v39 = vpop.f32.mrf.mxu1 }
  0xf0   : > { %793 = vst.msk [vmem:[%s1153_s30 + $0x64] sm:$0xf] %vm767_vm2, %v958_v30  ;;  %v963_v40 = vpack.c.bf16 %v637_v31, %v637_v31  ;;  %v635_v41 = vmax.f32 %v603_v32, 0.0  ;;  %v606_v42 = vadd.f32 %v1138_v20, %v567_v33  ;;  %v565_v43 = vmul.f32 %v1133_v18, %v517_v39 }
  0xf1   : > { %782 = vst.msk [vmem:[%s1153_s30 + $0x38] sm:$0xf] %vm767_vm2, %v947_v35  ;;  %v945_v44 = vpack.c.bf16 %v619_v36, %v619_v36  ;;  %v622_v45 = vmax.f32 %v590_v37, 0.0  ;;  %v588_v46 = vadd.f32 %v1138_v20, %v549_v38 }
  0xf2   : > { %798 = vst.msk [vmem:[%s1153_s30 + $0x78] sm:$0xf] %vm767_vm2, %v963_v40  ;;  %v961_v47 = vpack.c.bf16 %v635_v41, %v635_v41  ;;  %v638_v48 = vmax.f32 %v606_v42, 0.0  ;;  %v604_v49 = vadd.f32 %v1138_v20, %v565_v43 }
  0xf3   : > { %780 = vst.msk [vmem:[%s1153_s30 + $0x30] sm:$0xf] %vm767_vm2, %v945_v44  ;;  %v948_v50 = vpack.c.bf16 %v622_v45, %v622_v45  ;;  %v620_v51 = vmax.f32 %v588_v46, 0.0 }
  0xf4   : > { %796 = vst.msk [vmem:[%s1153_s30 + $0x70] sm:$0xf] %vm767_vm2, %v961_v47  ;;  %v964_v18 = vpack.c.bf16 %v638_v48, %v638_v48  ;;  %v636_v52 = vmax.f32 %v604_v49, 0.0 }
  0xf5   : > { %783 = vst.msk [vmem:[%s1153_s30 + $0x3c] sm:$0xf] %vm767_vm2, %v948_v50  ;;  %v946_v53 = vpack.c.bf16 %v620_v51, %v620_v51 }
  0xf6   : > { %799 = vst.msk [vmem:[%s1153_s30 + $0x7c] sm:$0xf] %vm767_vm2, %v964_v18  ;;  %v962_v54 = vpack.c.bf16 %v636_v52, %v636_v52 }
  0xf7   : > { %781 = vst.msk [vmem:[%s1153_s30 + $0x34] sm:$0xf] %vm767_vm2, %v946_v53 }
  0xf8   : > { %797 = vst.msk [vmem:[%s1153_s30 + $0x74] sm:$0xf] %vm767_vm2, %v962_v54 }
  0xf9 PF: > { %s14_s15 = sadd.s32 1, %s1050_s15  }
  0xfa   : > { %p11_p4 = scmp.ge.s32.totalorder %s14_s15, 4  }
  0xfc   :  { %13 = sbr.rel (!%p11_p4) target bundleno = 1 (0x1), region = 66 }

// kernel: bottleneck_forward.5
= control target key start
LH: loop header
LB: loop body
LE: loop exit
PB: predicated region body
PF: predicated region fallthrough
CT: control target
= control target key end

     0   :  { %vm113_vm0 = vcmask 1041408   ;;  %vm296_vm1 = vcmask 1043456   ;;  %vm88_vm2 = vcmask 31744   ;;  %vm271_vm3 = vcmask 64512   ;;  %s908_s0 = inlined_call_operand.vmem [shape: bf16[128,4], index: 0, kind: input, shape index: {}]   ;;  %s909_s1 = inlined_call_operand.vmem [shape: bf16[128,8], index: 1, kind: input, shape index: {}]   ;;  %s910_s2 = inlined_call_operand.vmem [shape: bf16[4,16], index: 2, kind: input, shape index: {}]   ;;  %s911_s3 = inlined_call_operand.vmem [shape: bf16[8,16], index: 3, kind: input, shape index: {}]   ;;  %s912_s4 = inlined_call_operand.vmem [shape: f32[1,16], index: 4, kind: input, shape index: {}]   ;;  %s913_s5 = inlined_call_operand.vmem [shape: f32[1,16], index: 5, kind: input, shape index: {}]   ;;  %s914_s6 = inlined_call_operand.vmem [shape: f32[1,16], index: 6, kind: input, shape index: {}]   ;;  %s915_s7 = inlined_call_operand.vmem [shape: f32[1,16], index: 7, kind: input, shape index: {}]   ;;  %s916_s8 = inlined_call_operand.hbm [shape: f32[128,16], index: 8, kind: output, shape index: {}]  }
   0x1   :  { %v47_v0 = vld [vmem:[%s910_s2] sm:$0x3]  ;;  %v651_v6 = vld [vmem:[%s908_s0 + $0x8] sm:$0xff]   ;;  %v653_v8 = vld [vmem:[%s908_s0 + $0x10] sm:$0xff]  }
   0x2   :  { %v230_v1 = vld [vmem:[%s911_s3] sm:$0xf]  ;;  %644 = vmatprep.subr.msk.bf16.mxu0 %vm113_vm0, %v47_v0  ;;  %v115_v2 = vsel %vm113_vm0, %v47_v0, 0  ;;  %v652_v7 = vld [vmem:[%s909_s1 + $0x8] sm:$0xff]   ;;  %v654_v9 = vld [vmem:[%s909_s1 + $0x10] sm:$0xff]  }
   0x3   :  { %645 = vmatprep.subr.msk.bf16.mxu1 %vm296_vm1, %v230_v1  ;;  %v298_v3 = vsel %vm296_vm1, %v230_v1, 0  ;;  %609 = vmatpush3.bf16.msra.mxu0 %v115_v2  ;;  %v649_v4 = vld [vmem:[%s908_s0] sm:$0xff]   ;;  %v655_v10 = vld [vmem:[%s908_s0 + $0x18] sm:$0xff]  }
   0x4   :  { %627 = vmatpush3.bf16.msra.mxu1 %v298_v3  ;;  %v650_v5 = vld [vmem:[%s909_s1] sm:$0xff]   ;;  %610 = vmatprep.mubr.msk.bf16.mxu0 %vm88_vm2, %v649_v4  ;;  %v656_v11 = vld [vmem:[%s909_s1 + $0x18] sm:$0xff]  }
   0x5   :  { %628 = vmatprep.mubr.msk.bf16.mxu1 %vm271_vm3, %v650_v5  ;;  %v657_v12 = vld [vmem:[%s908_s0 + $0x20] sm:$0xff]  }
   0x6   :  { %611 = vmatmul.mubr.msk.bf16.vlgmr.msra.gmra.mxu0 %vm88_vm2, %v651_v6  ;;  %v658_v13 = vld [vmem:[%s909_s1 + $0x20] sm:$0xff]  }
   0x7   :  { %629 = vmatmul.mubr.msk.bf16.vlgmr.msra.gmra.mxu1 %vm271_vm3, %v652_v7  ;;  %614 = vmatprep.mubr.msk.bf16.mxu0 %vm88_vm2, %v653_v8 }
   0x8   :  { %632 = vmatprep.mubr.msk.bf16.mxu1 %vm271_vm3, %v654_v9 }
   0xe   :  { %615 = vmatmul.mubr.msk.bf16.gmra.mxu0 %vm88_vm2, %v655_v10 }
   0xf   :  { %633 = vmatmul.mubr.msk.bf16.gmra.mxu1 %vm271_vm3, %v656_v11  ;;  %618 = vmatprep.mubr.msk.bf16.mxu0 %vm88_vm2, %v657_v12 }
  0x10   :  { %636 = vmatprep.mubr.msk.bf16.mxu1 %vm271_vm3, %v658_v13 }
  0x11   :  { %13 = vsyncpa [#allocation3], 0  ;;  %v659_v14 = vld [vmem:[%s908_s0 + $0x28] sm:$0xff]   ;;  %v661_v16 = vld [vmem:[%s908_s0 + $0x30] sm:$0xff]   ;;  %vm521_vm4 = vcmask 130048  }
  0x12   :  { %v660_v15 = vld [vmem:[%s909_s1 + $0x28] sm:$0xff]   ;;  %v662_v17 = vld [vmem:[%s909_s1 + $0x30] sm:$0xff]   ;;  %v663_v18 = vld [vmem:[%s908_s0 + $0x38] sm:$0xff]  }
  0x13   :  { %v664_v19 = vld [vmem:[%s909_s1 + $0x38] sm:$0xff]   ;;  %v808_v20 = vld [vmem:[%s912_s4] ss:$0 sm:$0xff]  ;;  %s687_s4 = smov [#allocation2]  }
  0x14   :  { %v813_v21 = vld [vmem:[%s914_s6] ss:$0 sm:$0xff] }
  0x15   :  { %v818_v23 = vld [vmem:[%s913_s5] ss:$0 sm:$0xff]  ;;  %s543_s5 = sshll.u32 %s687_s4, 4  ;;  %s544_s5 = int_to_ptr.vmem [resolvable:$true] %s543_s5 }
  0x16   :  { %619 = vmatmul.mubr.msk.bf16.gmra.mxu0 %vm88_vm2, %v659_v14  ;;  %v824_v26 = vld [vmem:[%s915_s7] ss:$0 sm:$0xff]  ;;  %s665_s6 = scalar_lea.vmem %s544_s5, 2048  ;;  %p670_p1 = scmp.lt.s32.totalorder %s544_s5, %s544_s5 }
  0x17   :  { %637 = vmatmul.mubr.msk.bf16.gmra.mxu1 %vm271_vm3, %v660_v15  ;;  %622 = vmatprep.mubr.msk.bf16.mxu0 %vm88_vm2, %v661_v16  ;;  %p666_p0 = scmp.ne.s32.totalorder %s544_s5, %s665_s6  ;;  %p671_p2 = scmp.lt.s32.totalorder %s665_s6, %s665_s6 }
  0x18   :  { %640 = vmatprep.mubr.msk.bf16.mxu1 %vm271_vm3, %v662_v17 }
  0x19   :  { %p672_p3 = por %p671_p2, %p670_p1 }
  0x1b   :  { %p673_p4 = pnand %p672_p3, %p666_p0 }
  0x1e   :  { %623 = vmatmul.mubr.msk.bf16.gmra.mxu0 %vm88_vm2, %v663_v18 }
  0x1f   :  { %641 = vmatmul.mubr.msk.bf16.gmra.mxu1 %vm271_vm3, %v664_v19 }
  0xc6   :  { %v612_v22 = vpop.f32.mrf.mxu0 }
  0xc7   :  { %v406_v24 = vmul.f32 %v612_v22, %v808_v20  ;;  %v630_v25 = vpop.f32.mrf.mxu1 }
  0xc8   :  { %v452_v27 = vmul.f32 %v630_v25, %v813_v21  ;;  %v151_v28 = vpop.f32.mrf.mxu0 }
  0xc9   :  { %v429_v29 = vadd.f32 %v818_v23, %v406_v24  ;;  %v404_v30 = vmul.f32 %v808_v20, %v151_v28  ;;  %v334_v31 = vpop.f32.mrf.mxu1 }
  0xca   :  { %v475_v32 = vadd.f32 %v824_v26, %v452_v27  ;;  %v450_v33 = vmul.f32 %v813_v21, %v334_v31  ;;  %v613_v34 = vpop.f32.mrf.mxu0 }
  0xcb   :  { %v427_v35 = vadd.f32 %v818_v23, %v404_v30  ;;  %v407_v36 = vmul.f32 %v613_v34, %v808_v20  ;;  %v631_v37 = vpop.f32.mrf.mxu1 }
  0xcc   :  { %v491_v38 = vadd.f32 %v475_v32, %v429_v29  ;;  %v473_v39 = vadd.f32 %v824_v26, %v450_v33  ;;  %v453_v40 = vmul.f32 %v631_v37, %v813_v21  ;;  %v154_v41 = vpop.f32.mrf.mxu0 }
  0xcd   :  { %v430_v42 = vadd.f32 %v818_v23, %v407_v36  ;;  %v405_v43 = vmul.f32 %v808_v20, %v154_v41  ;;  %v337_v44 = vpop.f32.mrf.mxu1 }
  0xce   :  { %v507_v45 = vmax.f32 %v491_v38, 0.0  ;;  %v489_v46 = vadd.f32 %v473_v39, %v427_v35  ;;  %v476_v47 = vadd.f32 %v824_v26, %v453_v40  ;;  %v451_v48 = vmul.f32 %v813_v21, %v337_v44  ;;  %v616_v49 = vpop.f32.mrf.mxu0 }
  0xcf   :  { %v428_v50 = vadd.f32 %v818_v23, %v405_v43  ;;  %v410_v51 = vmul.f32 %v616_v49, %v808_v20  ;;  %v634_v52 = vpop.f32.mrf.mxu1 }
  0xd0   :  { %524 = vst.msk [vmem:[#allocation2 + $0x10] sm:$0xff] %vm521_vm4, %v507_v45  ;;  %v505_v53 = vmax.f32 %v489_v46, 0.0  ;;  %v492_v54 = vadd.f32 %v476_v47, %v430_v42  ;;  %v474_v55 = vadd.f32 %v824_v26, %v451_v48  ;;  %v456_v56 = vmul.f32 %v634_v52, %v813_v21  ;;  %v167_v57 = vpop.f32.mrf.mxu0 }
  0xd1   :  { %v433_v58 = vadd.f32 %v818_v23, %v410_v51  ;;  %v408_v59 = vmul.f32 %v808_v20, %v167_v57  ;;  %v350_v60 = vpop.f32.mrf.mxu1 }
  0xd2   :  { %522 = vst.msk [vmem:[#allocation2] sm:$0xff] %vm521_vm4, %v505_v53  ;;  %v508_v61 = vmax.f32 %v492_v54, 0.0  ;;  %v490_v62 = vadd.f32 %v474_v55, %v428_v50  ;;  %v479_v63 = vadd.f32 %v824_v26, %v456_v56  ;;  %v454_v0 = vmul.f32 %v813_v21, %v350_v60  ;;  %v617_v1 = vpop.f32.mrf.mxu0 }
  0xd3   :  { %v431_v2 = vadd.f32 %v818_v23, %v408_v59  ;;  %v411_v3 = vmul.f32 %v617_v1, %v808_v20  ;;  %v635_v4 = vpop.f32.mrf.mxu1 }
  0xd4   :  { %525 = vst.msk [vmem:[#allocation2 + $0x18] sm:$0xff] %vm521_vm4, %v508_v61  ;;  %v506_v5 = vmax.f32 %v490_v62, 0.0  ;;  %v495_v6 = vadd.f32 %v479_v63, %v433_v58  ;;  %v477_v7 = vadd.f32 %v824_v26, %v454_v0  ;;  %v457_v8 = vmul.f32 %v635_v4, %v813_v21  ;;  %v170_v9 = vpop.f32.mrf.mxu0 }
  0xd5   :  { %v434_v10 = vadd.f32 %v818_v23, %v411_v3  ;;  %v409_v11 = vmul.f32 %v808_v20, %v170_v9  ;;  %v353_v12 = vpop.f32.mrf.mxu1 }
  0xd6   :  { %523 = vst.msk [vmem:[#allocation2 + $0x8] sm:$0xff] %vm521_vm4, %v506_v5  ;;  %v511_v13 = vmax.f32 %v495_v6, 0.0  ;;  %v493_v14 = vadd.f32 %v477_v7, %v431_v2  ;;  %v480_v15 = vadd.f32 %v824_v26, %v457_v8  ;;  %v455_v16 = vmul.f32 %v813_v21, %v353_v12  ;;  %v620_v17 = vpop.f32.mrf.mxu0 }
  0xd7   :  { %v432_v18 = vadd.f32 %v818_v23, %v409_v11  ;;  %v414_v19 = vmul.f32 %v620_v17, %v808_v20  ;;  %v638_v22 = vpop.f32.mrf.mxu1 }
  0xd8   :  { %528 = vst.msk [vmem:[#allocation2 + $0x30] sm:$0xff] %vm521_vm4, %v511_v13  ;;  %v509_v24 = vmax.f32 %v493_v14, 0.0  ;;  %v496_v25 = vadd.f32 %v480_v15, %v434_v10  ;;  %v478_v27 = vadd.f32 %v824_v26, %v455_v16  ;;  %v460_v28 = vmul.f32 %v638_v22, %v813_v21  ;;  %v183_v29 = vpop.f32.mrf.mxu0 }
  0xd9   :  { %v437_v30 = vadd.f32 %v818_v23, %v414_v19  ;;  %v412_v31 = vmul.f32 %v808_v20, %v183_v29  ;;  %v366_v32 = vpop.f32.mrf.mxu1 }
  0xda   :  { %526 = vst.msk [vmem:[#allocation2 + $0x20] sm:$0xff] %vm521_vm4, %v509_v24  ;;  %v512_v33 = vmax.f32 %v496_v25, 0.0  ;;  %v494_v34 = vadd.f32 %v478_v27, %v432_v18  ;;  %v483_v35 = vadd.f32 %v824_v26, %v460_v28  ;;  %v458_v36 = vmul.f32 %v813_v21, %v366_v32  ;;  %v621_v37 = vpop.f32.mrf.mxu0 }
  0xdb   :  { %v435_v38 = vadd.f32 %v818_v23, %v412_v31  ;;  %v415_v39 = vmul.f32 %v621_v37, %v808_v20  ;;  %v639_v40 = vpop.f32.mrf.mxu1 }
  0xdc   :  { %529 = vst.msk [vmem:[#allocation2 + $0x38] sm:$0xff] %vm521_vm4, %v512_v33  ;;  %v510_v41 = vmax.f32 %v494_v34, 0.0  ;;  %v499_v42 = vadd.f32 %v483_v35, %v437_v30  ;;  %v481_v43 = vadd.f32 %v824_v26, %v458_v36  ;;  %v461_v44 = vmul.f32 %v639_v40, %v813_v21  ;;  %v186_v45 = vpop.f32.mrf.mxu0 }
  0xdd   :  { %v438_v46 = vadd.f32 %v818_v23, %v415_v39  ;;  %v413_v47 = vmul.f32 %v808_v20, %v186_v45  ;;  %v369_v48 = vpop.f32.mrf.mxu1 }
  0xde   :  { %527 = vst.msk [vmem:[#allocation2 + $0x28] sm:$0xff] %vm521_vm4, %v510_v41  ;;  %v515_v49 = vmax.f32 %v499_v42, 0.0  ;;  %v497_v50 = vadd.f32 %v481_v43, %v435_v38  ;;  %v484_v51 = vadd.f32 %v824_v26, %v461_v44  ;;  %v459_v52 = vmul.f32 %v813_v21, %v369_v48  ;;  %v624_v53 = vpop.f32.mrf.mxu0 }
  0xdf   :  { %v436_v54 = vadd.f32 %v818_v23, %v413_v47  ;;  %v418_v55 = vmul.f32 %v624_v53, %v808_v20  ;;  %v642_v56 = vpop.f32.mrf.mxu1 }
  0xe0   :  { %532 = vst.msk [vmem:[#allocation2 + $0x50] sm:$0xff] %vm521_vm4, %v515_v49  ;;  %v513_v57 = vmax.f32 %v497_v50, 0.0  ;;  %v500_v58 = vadd.f32 %v484_v51, %v438_v46  ;;  %v482_v59 = vadd.f32 %v824_v26, %v459_v52  ;;  %v464_v60 = vmul.f32 %v642_v56, %v813_v21  ;;  %v199_v61 = vpop.f32.mrf.mxu0 }
  0xe1   :  { %v441_v62 = vadd.f32 %v818_v23, %v418_v55  ;;  %v416_v63 = vmul.f32 %v808_v20, %v199_v61  ;;  %v382_v0 = vpop.f32.mrf.mxu1 }
  0xe2   :  { %530 = vst.msk [vmem:[#allocation2 + $0x40] sm:$0xff] %vm521_vm4, %v513_v57  ;;  %v516_v1 = vmax.f32 %v500_v58, 0.0  ;;  %v498_v2 = vadd.f32 %v482_v59, %v436_v54  ;;  %v487_v3 = vadd.f32 %v824_v26, %v464_v60  ;;  %v462_v4 = vmul.f32 %v813_v21, %v382_v0  ;;  %v625_v5 = vpop.f32.mrf.mxu0 }
  0xe3   :  { %v439_v6 = vadd.f32 %v818_v23, %v416_v63  ;;  %v419_v7 = vmul.f32 %v625_v5, %v808_v20  ;;  %v643_v8 = vpop.f32.mrf.mxu1 }
  0xe4   :  { %533 = vst.msk [vmem:[#allocation2 + $0x58] sm:$0xff] %vm521_vm4, %v516_v1  ;;  %v514_v9 = vmax.f32 %v498_v2, 0.0  ;;  %v503_v10 = vadd.f32 %v487_v3, %v441_v62  ;;  %v485_v11 = vadd.f32 %v824_v26, %v462_v4  ;;  %v465_v12 = vmul.f32 %v643_v8, %v813_v21  ;;  %v202_v13 = vpop.f32.mrf.mxu0 }
  0xe5   :  { %v442_v14 = vadd.f32 %v818_v23, %v419_v7  ;;  %v417_v15 = vmul.f32 %v808_v20, %v202_v13  ;;  %v385_v16 = vpop.f32.mrf.mxu1 }
  0xe6   :  { %531 = vst.msk [vmem:[#allocation2 + $0x48] sm:$0xff] %vm521_vm4, %v514_v9  ;;  %v519_v17 = vmax.f32 %v503_v10, 0.0  ;;  %v501_v18 = vadd.f32 %v485_v11, %v439_v6  ;;  %v488_v19 = vadd.f32 %v824_v26, %v465_v12  ;;  %v463_v22 = vmul.f32 %v813_v21, %v385_v16 }
  0xe7   :  { %v440_v24 = vadd.f32 %v818_v23, %v417_v15 }
  0xe8   :  { %536 = vst.msk [vmem:[#allocation2 + $0x70] sm:$0xff] %vm521_vm4, %v519_v17  ;;  %v517_v25 = vmax.f32 %v501_v18, 0.0  ;;  %v504_v27 = vadd.f32 %v488_v19, %v442_v14  ;;  %v486_v28 = vadd.f32 %v824_v26, %v463_v22 }
  0xea   :  { %534 = vst.msk [vmem:[#allocation2 + $0x60] sm:$0xff] %vm521_vm4, %v517_v25  ;;  %v520_v20 = vmax.f32 %v504_v27, 0.0  ;;  %v502_v29 = vadd.f32 %v486_v28, %v440_v24 }
  0xec   :  { %537 = vst.msk [vmem:[#allocation2 + $0x78] sm:$0xff] %vm521_vm4, %v520_v20  ;;  %v518_v30 = vmax.f32 %v502_v29, 0.0 }
  0xee   :  { %535 = vst.msk [vmem:[#allocation2 + $0x68] sm:$0xff] %vm521_vm4, %v518_v30 }
  0xef   :  { %676 = shalt.err (!%p673_p4)
}
  0xf0   :  { %s688_s7 = smov 128   ;;  %s689_s21 = smov 8  }
  0xf1   :  { %549 = dma.vmem_to_hbm [thread:$0]  %s544_s5, 2048, %s916_s8, [#allocation3], %s688_s7, %s688_s7, %s689_s21  }
  0xf2   :  { %685 = dma.done.wait [#allocation3], 2048  }
  0xf3   :  { %686 = vsyncadd [#allocation3], 4294965248 }
  0xf4   :  { %553 = vsyncpa [#allocation3], 1 }

// kernel: bottleneck_forward.4
= control target key start
LH: loop header
LB: loop body
LE: loop exit
PB: predicated region body
PF: predicated region fallthrough
CT: control target
= control target key end

     0   :  { %s1899_s15 = smov 0   ;;  %s2261_s0 = inlined_call_operand.vmem [shape: bf16[2,4,9,9,4], index: 0, kind: input, shape index: {}]   ;;  %s2262_s1 = inlined_call_operand.vmem [shape: bf16[9,4,4], index: 1, kind: input, shape index: {}]   ;;  %s2263_s2 = inlined_call_operand.vmem [shape: f32[1,4], index: 2, kind: input, shape index: {}]   ;;  %s2264_s3 = inlined_call_operand.vmem [shape: f32[1,4], index: 3, kind: input, shape index: {}]   ;;  %s2265_s4 = inlined_call_operand.vmem [shape: bf16[2,64,4], index: 4, kind: output, shape index: {}]  }
   0x1 LB: > { %s1544_s16 = sadd.s32 4294967295, %s1872_s15   ;;  %p1548_p0 = scmp.ge.s32.totalorder %s1872_s15, 1  ;;  %s1872_s15 = sphi %s1899_s15, %s14_s15  }
   0x2   : > { %p162_p1 = scmp.lt.s32.totalorder %s1872_s15, 3 }
   0x4   : > { %p163_p2 = pnand %p1548_p0, %p162_p1 }
   0x5   : > { %p188_p3 = scmp.lt.s32.totalorder (!%p163_p2), %s1544_s16, 1 }
   0x6   : > { %166 = sbr.rel (%p163_p2) target bundleno = 302 (0x12e), region = 36 }
   0xb   : > { %v1585_v0 = vld [vmem:[%s2262_s1 + $0x2] sm:$0x3]  ;;  %vm289_vm0 = vcmask 1041408   ;;  %v253_v2 = vld [vmem:[%s2262_s1] sm:$0x3]  ;;  %s2269_s16 = smov (!%p188_p3, %s1544_s16), 1 }
   0xc   : > { %1824 = vmatprep.subr.msk.bf16.mxu1 %vm289_vm0, %v1585_v0  ;;  %1823 = vmatprep.subr.msk.bf16.mxu0 %vm289_vm0, %v1585_v0  ;;  %v291_v1 = vsel %vm289_vm0, %v1585_v0, 0  ;;  %v1602_v3 = vld [vmem:[%s2262_s1 + $0x4] sm:$0x3]  ;;  %v1611_v4 = vld [vmem:[%s2262_s1 + $0x6] sm:$0x3]  ;;  %s1833_s25 = smul.u32 288, %s2269_s16 }
   0xd   : > { %1822 = vmatpush3.bf16.msra.mxu1 %v291_v1  ;;  %1732 = vmatpush3.bf16.msra.mxu0 %v291_v1  ;;  %vm276_vm1 = vcmask 31744   ;;  %v391_v5 = vsel %vm289_vm0, %v253_v2, 0  ;;  %v600_v6 = vsel %vm289_vm0, %v1602_v3, 0  ;;  %vm458_vm2 = vsmask.f32 3328  ;;  %s1677_s19 = sshll.u32 %s2269_s16, 5 }
   0xe   : > { %1825 = vmatprep.subr.msk.bf16.mxu1 %vm289_vm0, %v253_v2  ;;  %1826 = vmatprep.subr.msk.bf16.mxu0 %vm289_vm0, %v1602_v3  ;;  %s1931_s28 = scalar_lea.vmem %s2261_s0, %s1833_s25  ;;  %vm459_vm3 = vsmask.f32 7440  ;;  %v1935_v7 = vsel %vm289_vm0, %v1611_v4, 0  ;;  %v1620_v11 = vld [vmem:[%s2262_s1 + $0x8] sm:$0x3]  ;;  %s2229_s16 = scalar_lea.vmem %s2265_s4, %s1677_s19  ;;  %vm1480_vm5 = vcmask 27648  }
   0xf   : > { %v1552_v8 = vld [vmem:[%s1931_s28 + $0x48] sm:$0xf]  ;;  %v1939_v9 = vld [vmem:[%s1931_s28 + $0x50] sm:$0xf]  ;;  %v1942_v10 = vld [vmem:[%s1931_s28 + $0x58] sm:$0xf] }
  0x10   : > { %v1586_v12 = vcombine.low %v1552_v8, %v1939_v9  ;;  %v1949_v13 = vld [vmem:[%s1931_s28 + $0x60] sm:$0xf]  ;;  %v1952_v14 = vld [vmem:[%s1931_s28 + $0x68] sm:$0xf]  ;;  %v1955_v15 = vld [vmem:[%s1931_s28 + $0x70] sm:$0xf] }
  0x11   : > { %v1958_v16 = vld [vmem:[%s1931_s28 + $0x78] sm:$0xf]  ;;  %v1961_v17 = vld [vmem:[%s1931_s28 + $0x80] sm:$0xf]  ;;  %v1587_v18 = vcombine.low %v1942_v10, %v1949_v13  ;;  %v1588_v19 = vcombine.low %v1952_v14, %v1955_v15  ;;  %v1972_v22 = vld [vmem:[%s1931_s28 + $0x8] sm:$0xf] }
  0x12   : > { %v199_v20 = vld [vmem:[%s1931_s28] sm:$0xf]  ;;  %1733 = vmatprep.mubr.msk.bf16.mxu0 %vm276_vm1, %v1586_v12  ;;  %v1589_v21 = vcombine.low %v1958_v16, %v1961_v17  ;;  %v1975_v25 = vld [vmem:[%s1931_s28 + $0x10] sm:$0xf]  ;;  %v476_v27 = vshrl.u32 %v1972_v22, 16  ;;  %v479_v28 = vshll.u32 %v1972_v22, 16  ;;  %vm2004_vm4 = vmor %vm458_vm2, %vm459_vm3 }
  0x13   : > { %v462_v23 = vshrl.u32 %v199_v20, 16  ;;  %v465_v24 = vshll.u32 %v199_v20, 16  ;;  %1737 = vmatprep.mubr.msk.bf16.mxu1 %vm276_vm1, %v1588_v19  ;;  %1734 = vmatmul.mubr.msk.bf16.vlgmr.msra.gmra.mxu0 %vm276_vm1, %v1587_v18  ;;  %v1594_v26 = vcombine.low %v199_v20, %v1972_v22  ;;  %v1983_v29 = vld [vmem:[%s1931_s28 + $0x18] sm:$0xf]  ;;  %v490_v30 = vshrl.u32 %v1975_v25, 16 }
  0x14   : > { %1738 = vmatmul.mubr.msk.bf16.vlgmr.msra.gmra.mxu1 %vm276_vm1, %v1589_v21  ;;  %1752 = vmatpush3.bf16.msra.mxu0 %v600_v6  ;;  %v493_v33 = vshll.u32 %v1975_v25, 16  ;;  %v200_v34 = vld [vmem:[%s1931_s28 + $0x4] sm:$0x1]  ;;  %v1990_v35 = vsel %vm289_vm0, %v1620_v11, 0  ;;  %v504_v36 = vshrl.u32 %v1983_v29, 16  ;;  %v507_v37 = vshll.u32 %v1983_v29, 16 }
  0x15   : > { %v464_v31 = vrot.slane %v462_v23, 4  ;;  %v467_v32 = vrot.slane %v465_v24, 5  ;;  %1742 = vmatpush3.bf16.msra.mxu1 %v391_v5  ;;  %1743 = vmatprep.mubr.msk.bf16.mxu1 %vm276_vm1, %v1594_v26  ;;  %v202_v38 = vld [vmem:[%s1931_s28 + $0xc] sm:$0x1]  ;;  %v471_v39 = vshll.u32 %v200_v34, 16  ;;  %v478_v40 = vrot.slane %v476_v27, 4 }
  0x16   : > { %1827 = vmatprep.subr.msk.bf16.mxu1 %vm289_vm0, %v1611_v4  ;;  %v1595_v41 = vcombine.low %v1975_v25, %v1983_v29  ;;  %v481_v43 = vrot.slane %v479_v28, 5  ;;  %v485_v44 = vshll.u32 %v202_v38, 16  ;;  %v204_v45 = vld [vmem:[%s1931_s28 + $0x14] sm:$0x1]  ;;  %v206_v46 = vld [vmem:[%s1931_s28 + $0x1c] sm:$0x1]  ;;  %1828 = vmatprep.subr.msk.bf16.mxu0 %vm289_vm0, %v1620_v11 }
  0x17   : > { %v468_v42 = vor.u32 %v467_v32, %v464_v31  ;;  %v473_v48 = vrot.slane %v471_v39, 5  ;;  %v492_v49 = vrot.slane %v490_v30, 4  ;;  %v495_v50 = vrot.slane %v493_v33, 5  ;;  %v2009_v52 = vld [vmem:[%s1931_s28 + $0x20] sm:$0xf] }
  0x18   : > { %v499_v51 = vshll.u32 %v204_v45, 16  ;;  %v482_v54 = vor.u32 %v481_v43, %v478_v40  ;;  %v487_v55 = vrot.slane %v485_v44, 5  ;;  %v506_v56 = vrot.slane %v504_v36, 4  ;;  %v1629_v57 = vld [vmem:[%s2262_s1 + $0xa] sm:$0x3] }
  0x19   : > { %v469_v53 = vrot.slane %v468_v42, 4  ;;  %v496_v58 = vor.u32 %v495_v50, %v492_v49  ;;  %v509_v60 = vrot.slane %v507_v37, 5  ;;  %v513_v61 = vshll.u32 %v206_v46, 16  ;;  %v2015_v62 = vld [vmem:[%s1931_s28 + $0x28] sm:$0xf] }
  0x1a   : > { %v501_v59 = vrot.slane %v499_v51, 5  ;;  %v483_v0 = vrot.slane %v482_v54, 4  ;;  %v1596_v1 = vcombine.low %v2009_v52, %v2015_v62  ;;  %v518_v2 = vshrl.u32 %v2009_v52, 16  ;;  %v2023_v3 = vld [vmem:[%s1931_s28 + $0x30] sm:$0xf] }
  0x1b   : > { %v474_v63 = vsel %vm2004_vm4, %v469_v53, %v473_v48  ;;  %v497_v4 = vrot.slane %v496_v58, 4  ;;  %v510_v5 = vor.u32 %v509_v60, %v506_v56  ;;  %v515_v6 = vrot.slane %v513_v61, 5  ;;  %v2027_v11 = vld [vmem:[%s1931_s28 + $0x38] sm:$0xf]  ;;  %v208_v20 = vld [vmem:[%s1931_s28 + $0x24] sm:$0x1] }
  0x1c   : > { %v521_v8 = vshll.u32 %v2009_v52, 16  ;;  %1744 = vmatmul.mubr.msk.bf16.vlgmr.msra.gmra.mxu1 %vm276_vm1, %v1595_v41  ;;  %v2032_v12 = vsel %vm2004_vm4, %v483_v0, %v487_v55  ;;  %v532_v18 = vshrl.u32 %v2015_v62, 16  ;;  %v535_v19 = vshll.u32 %v2015_v62, 16  ;;  %v210_v28 = vld [vmem:[%s1931_s28 + $0x2c] sm:$0x1] }
  0x1d   : > { %v2038_v21 = vsel %vm289_vm0, %v1629_v57, 0  ;;  %v1603_v23 = vcombine.low %v474_v63, %v2032_v12  ;;  %1762 = vmatpush3.bf16.msra.mxu1 %v1935_v7  ;;  %v2044_v24 = vsel %vm2004_vm4, %v497_v4, %v501_v59  ;;  %v511_v26 = vrot.slane %v510_v5, 4  ;;  %1747 = vmatprep.mubr.msk.bf16.mxu1 %vm276_vm1, %v1596_v1  ;;  %v212_v30 = vld [vmem:[%s1931_s28 + $0x34] sm:$0x1]  ;;  %v214_v34 = vld [vmem:[%s1931_s28 + $0x3c] sm:$0x1] }
  0x1e   : > { %v1597_v27 = vcombine.low %v2023_v3, %v2027_v11  ;;  %v546_v31 = vshrl.u32 %v2023_v3, 16  ;;  %v549_v32 = vshll.u32 %v2023_v3, 16  ;;  %v560_v7 = vshrl.u32 %v2027_v11, 16  ;;  %1829 = vmatprep.subr.msk.bf16.mxu1 %vm289_vm0, %v1629_v57  ;;  %v1561_v40 = vld [vmem:[%s1931_s28 + $0x90] sm:$0xf] }
  0x1f   : > { %v563_v33 = vshll.u32 %v2027_v11, 16  ;;  %1753 = vmatprep.mubr.msk.bf16.mxu0 %vm276_vm1, %v1603_v23  ;;  %v2060_v36 = vsel %vm2004_vm4, %v511_v26, %v515_v6  ;;  %v520_v37 = vrot.slane %v518_v2, 4  ;;  %v523_v38 = vrot.slane %v521_v8, 5  ;;  %v1563_v41 = vld [vmem:[%s1931_s28 + $0x98] sm:$0xf] }
  0x20   : > { %v527_v39 = vshll.u32 %v208_v20, 16  ;;  %v1638_v42 = vld [vmem:[%s2262_s1 + $0xc] sm:$0x3]  ;;  %v1604_v43 = vcombine.low %v2044_v24, %v2060_v36  ;;  %v534_v44 = vrot.slane %v532_v18, 4  ;;  %v537_v45 = vrot.slane %v535_v19, 5 }
  0x21   : > { %v541_v46 = vshll.u32 %v210_v28, 16  ;;  %v524_v48 = vor.u32 %v523_v38, %v520_v37  ;;  %v548_v50 = vrot.slane %v546_v31, 4  ;;  %v551_v51 = vrot.slane %v549_v32, 5  ;;  %v1565_v6 = vld [vmem:[%s1931_s28 + $0xa0] sm:$0xf] }
  0x22   : > { %v529_v49 = vrot.slane %v527_v39, 5  ;;  %1754 = vmatmul.mubr.msk.bf16.vlgmr.msra.gmra.mxu0 %vm276_vm1, %v1604_v43  ;;  %v538_v53 = vor.u32 %v537_v45, %v534_v44  ;;  %v555_v55 = vshll.u32 %v212_v30, 16  ;;  %v562_v56 = vrot.slane %v560_v7, 4  ;;  %v1567_v8 = vld [vmem:[%s1931_s28 + $0xa8] sm:$0xf] }
  0x23   : > { %v543_v54 = vrot.slane %v541_v46, 5  ;;  %1772 = vmatpush3.bf16.msra.mxu0 %v1990_v35  ;;  %v525_v57 = vrot.slane %v524_v48, 4  ;;  %v552_v58 = vor.u32 %v551_v51, %v548_v50  ;;  %v565_v59 = vrot.slane %v563_v33, 5  ;;  %v1856_v31 = vld [vmem:[%s1931_s28 + $0xd8] ss:$8 sps:$4 sm:$0xff]  }
  0x24   : > { %v569_v60 = vshll.u32 %v214_v34, 16  ;;  %1748 = vmatmul.mubr.msk.bf16.gmra.mxu1 %vm276_vm1, %v1597_v27  ;;  %v539_v61 = vrot.slane %v538_v53, 4  ;;  %v557_v63 = vrot.slane %v555_v55, 5  ;;  %v1612_v0 = vcombine.low %v1561_v40, %v1563_v41  ;;  %1830 = vmatprep.subr.msk.bf16.mxu0 %vm289_vm0, %v1638_v42  ;;  %v1569_v32 = vld [vmem:[%s1931_s28 + $0xb0] sm:$0xf] }
  0x25   : > { %v896_v1 = vshrl.u32 %v1561_v40, 16  ;;  %v2075_v2 = vsel %vm2004_vm4, %v525_v57, %v529_v49  ;;  %v553_v35 = vrot.slane %v552_v58, 4  ;;  %v566_v4 = vor.u32 %v565_v59, %v562_v56  ;;  %v1571_v37 = vld [vmem:[%s1931_s28 + $0xb8] sm:$0xf]  ;;  %v1573_v44 = vld [vmem:[%s1931_s28 + $0xc0] sm:$0xf] }
  0x26   : > { %v571_v5 = vrot.slane %v569_v60, 5  ;;  %v2081_v18 = vsel %vm2004_vm4, %v539_v61, %v543_v54  ;;  %1763 = vmatprep.mubr.msk.bf16.mxu1 %vm276_vm1, %v1612_v0  ;;  %v899_v20 = vshll.u32 %v1561_v40, 16  ;;  %v2087_v23 = vsel %vm289_vm0, %v1638_v42, 0  ;;  %v1575_v45 = vld [vmem:[%s1931_s28 + $0xc8] sm:$0xf] }
  0x27   : > { %v2084_v19 = vrot.slane %v896_v1, 4  ;;  %v1605_v26 = vcombine.low %v2075_v2, %v2081_v18  ;;  %v2093_v27 = vsel %vm2004_vm4, %v553_v35, %v557_v63  ;;  %v567_v28 = vrot.slane %v566_v4, 4  ;;  %v1562_v1 = vld [vmem:[%s1931_s28 + $0x94] sm:$0x1]  ;;  %v1857_v35 = vld [vmem:[%s1931_s28 + $0xe8] ss:$8 sps:$4 sm:$0xff]  }
  0x28   : > { %v910_v30 = vshrl.u32 %v1563_v41, 16  ;;  %v913_v7 = vshll.u32 %v1563_v41, 16  ;;  %v1613_v33 = vcombine.low %v1565_v6, %v1567_v8  ;;  %v924_v34 = vshrl.u32 %v1565_v6, 16  ;;  %v2110_v41 = vld [vmem:[%s2262_s1 + $0xe] sm:$0x3] }
  0x29   : > { %v1639_v38 = vcombine.low %v1972_v22, %v1975_v25  ;;  %1757 = vmatprep.mubr.msk.bf16.mxu0 %vm276_vm1, %v1605_v26  ;;  %v2103_v39 = vsel %vm2004_vm4, %v567_v28, %v571_v5  ;;  %v901_v40 = vrot.slane %v899_v20, 5  ;;  %v927_v42 = vshll.u32 %v1565_v6, 16  ;;  %v1564_v20 = vld [vmem:[%s1931_s28 + $0x9c] sm:$0x1] }
  0x2a   : > { %v938_v43 = vshrl.u32 %v1567_v8, 16  ;;  %v1606_v46 = vcombine.low %v2093_v27, %v2103_v39  ;;  %v912_v48 = vrot.slane %v910_v30, 4  ;;  %v915_v49 = vrot.slane %v913_v7, 5 }
  0x2b   : > { %v941_v50 = vshll.u32 %v1567_v8, 16  ;;  %v926_v51 = vrot.slane %v924_v34, 4  ;;  %v929_v53 = vrot.slane %v927_v42, 5  ;;  %v1614_v54 = vcombine.low %v1569_v32, %v1571_v37 }
  0x2c   : > { %v952_v55 = vshrl.u32 %v1569_v32, 16  ;;  %1758 = vmatmul.mubr.msk.bf16.gmra.mxu0 %vm276_vm1, %v1606_v46  ;;  %1764 = vmatmul.mubr.msk.bf16.vlgmr.msra.gmra.mxu1 %vm276_vm1, %v1613_v33  ;;  %v940_v56 = vrot.slane %v938_v43, 4  ;;  %v955_v57 = vshll.u32 %v1569_v32, 16  ;;  %v966_v58 = vshrl.u32 %v1571_v37, 16  ;;  %v1860_v43 = vld [vmem:[%s1931_s28 + $0xf8] ss:$8 sps:$4 sm:$0xff]  }
  0x2d   : > { %v969_v59 = vshll.u32 %v1571_v37, 16  ;;  %v943_v60 = vrot.slane %v941_v50, 5  ;;  %1773 = vmatprep.mubr.msk.bf16.mxu0 %vm276_vm1, %v1856_v31  ;;  %1782 = vmatpush3.bf16.msra.mxu1 %v2038_v21  ;;  %v980_v63 = vshrl.u32 %v1573_v44, 16  ;;  %v983_v0 = vshll.u32 %v1573_v44, 16  ;;  %v1566_v31 = vld [vmem:[%s1931_s28 + $0xa4] sm:$0x1] }
  0x2e   : > { %v954_v61 = vrot.slane %v952_v55, 4  ;;  %1767 = vmatprep.mubr.msk.bf16.mxu1 %vm276_vm1, %v1614_v54  ;;  %v957_v4 = vrot.slane %v955_v57, 5  ;;  %v968_v5 = vrot.slane %v966_v58, 4  ;;  %v1615_v6 = vcombine.low %v1573_v44, %v1575_v45  ;;  %1831 = vmatprep.subr.msk.bf16.mxu1 %vm289_vm0, %v2110_v41  ;;  %v1568_v37 = vld [vmem:[%s1931_s28 + $0xac] sm:$0x1] }
  0x2f   : > { %v994_v8 = vshrl.u32 %v1575_v45, 16  ;;  %v971_v26 = vrot.slane %v969_v59, 5  ;;  %v982_v21 = vrot.slane %v980_v63, 4  ;;  %v997_v28 = vshll.u32 %v1575_v45, 16  ;;  %v1656_v54 = vld [vmem:[%s2262_s1 + $0x10] sm:$0x3] }
  0x30   : > { %v902_v30 = vor.u32 %v901_v40, %v2084_v19  ;;  %v985_v32 = vrot.slane %v983_v0, 5  ;;  %v905_v7 = vshll.u32 %v1562_v1, 16  ;;  %v916_v33 = vor.u32 %v915_v49, %v912_v48  ;;  %v1570_v57 = vld [vmem:[%s1931_s28 + $0xb4] sm:$0x1]  ;;  %v1572_v63 = vld [vmem:[%s1931_s28 + $0xbc] sm:$0x1] }
  0x31   : > { %v919_v34 = vshll.u32 %v1564_v20, 16  ;;  %v996_v42 = vrot.slane %v994_v8, 4  ;;  %v930_v46 = vor.u32 %v929_v53, %v926_v51  ;;  %v933_v50 = vshll.u32 %v1566_v31, 16  ;;  %v1576_v31 = vld [vmem:[%s1931_s28 + $0xcc] sm:$0x1] }
  0x32   : > { %v903_v44 = vrot.slane %v902_v30, 4  ;;  %v907_v45 = vrot.slane %v905_v7, 5  ;;  %v917_v19 = vrot.slane %v916_v33, 4  ;;  %v944_v55 = vor.u32 %v943_v60, %v940_v56  ;;  %v1574_v56 = vld [vmem:[%s1931_s28 + $0xc4] sm:$0x1] }
  0x33   : > { %v921_v40 = vrot.slane %v919_v34, 5  ;;  %v999_v58 = vrot.slane %v997_v28, 5  ;;  %v931_v48 = vrot.slane %v930_v46, 4  ;;  %v935_v49 = vrot.slane %v933_v50, 5  ;;  %v1861_v34 = vld [vmem:[%s1931_s28 + $0x108] ss:$8 sps:$4 sm:$0xff]  }
  0x34   : > { %v947_v59 = vshll.u32 %v1568_v37, 16  ;;  %1774 = vmatmul.mubr.msk.bf16.vlgmr.msra.gmra.mxu0 %vm276_vm1, %v1857_v35  ;;  %1768 = vmatmul.mubr.msk.bf16.gmra.mxu1 %vm276_vm1, %v1615_v6  ;;  %v908_v51 = vsel %vm2004_vm4, %v903_v44, %v907_v45  ;;  %v945_v0 = vrot.slane %v944_v55, 4  ;;  %v958_v1 = vor.u32 %v957_v4, %v954_v61 }
  0x35   : > { %v922_v53 = vsel %vm2004_vm4, %v917_v19, %v921_v40  ;;  %1792 = vmatpush3.bf16.msra.mxu0 %v2087_v23  ;;  %1777 = vmatprep.mubr.msk.bf16.mxu0 %vm276_vm1, %v1860_v43  ;;  %v936_v35 = vsel %vm2004_vm4, %v931_v48, %v935_v49  ;;  %v961_v8 = vshll.u32 %v1570_v57, 16  ;;  %v972_v28 = vor.u32 %v971_v26, %v968_v5 }
  0x36   : > { %v1630_v60 = vcombine.low %v908_v51, %v922_v53  ;;  %v949_v6 = vrot.slane %v947_v59, 5  ;;  %1832 = vmatprep.subr.msk.bf16.mxu0 %vm289_vm0, %v1656_v54  ;;  %v959_v20 = vrot.slane %v958_v1, 4  ;;  %v975_v30 = vshll.u32 %v1572_v63, 16  ;;  %v216_v59 = vld [vmem:[%s1931_s28 + $0x44] sm:$0x1] }
  0x37   : > { %v986_v61 = vor.u32 %v985_v32, %v982_v21  ;;  %v963_v4 = vrot.slane %v961_v8, 5  ;;  %v989_v7 = vshll.u32 %v1574_v56, 16  ;;  %v1000_v33 = vor.u32 %v999_v58, %v996_v42  ;;  %v1560_v21 = vld [vmem:[%s1931_s28 + $0x88] sm:$0xf] }
  0x38   : > { %1783 = vmatprep.mubr.msk.bf16.mxu1 %vm276_vm1, %v1630_v60  ;;  %v950_v23 = vsel %vm2004_vm4, %v945_v0, %v949_v6  ;;  %v973_v43 = vrot.slane %v972_v28, 4  ;;  %v977_v44 = vrot.slane %v975_v30, 5  ;;  %v1003_v45 = vshll.u32 %v1576_v31, 16 }
  0x39   : > { %v1631_v37 = vcombine.low %v936_v35, %v950_v23  ;;  %v987_v46 = vrot.slane %v986_v61, 4  ;;  %v964_v5 = vsel %vm2004_vm4, %v959_v20, %v963_v4  ;;  %v991_v26 = vrot.slane %v989_v7, 5 }
  0x3a   : > { %v1001_v50 = vrot.slane %v1000_v33, 4  ;;  %v1226_v32 = vsel %vm289_vm0, %v2110_v41, 0  ;;  %v978_v19 = vsel %vm2004_vm4, %v973_v43, %v977_v44  ;;  %v1005_v42 = vrot.slane %v1003_v45, 5 }
  0x3b   : > { %v1632_v40 = vcombine.low %v964_v5, %v978_v19  ;;  %v1651_v55 = vcombine.low %v1961_v17, %v1560_v21  ;;  %v992_v41 = vsel %vm2004_vm4, %v987_v46, %v991_v26  ;;  %v1640_v58 = vcombine.low %v1983_v29, %v2009_v52 }
  0x3c   : > { %1778 = vmatmul.mubr.msk.bf16.gmra.mxu0 %vm276_vm1, %v1861_v34  ;;  %1784 = vmatmul.mubr.msk.bf16.vlgmr.msra.gmra.mxu1 %vm276_vm1, %v1631_v37  ;;  %v1006_v57 = vsel %vm2004_vm4, %v1001_v50, %v1005_v42  ;;  %v1641_v17 = vcombine.low %v2015_v62, %v2023_v3  ;;  %v1648_v22 = vcombine.low %v1939_v9, %v1942_v10  ;;  %v1335_v25 = vsel %vm289_vm0, %v1656_v54, 0 }
  0x3d   : > { %1793 = vmatprep.mubr.msk.bf16.mxu0 %vm276_vm1, %v1639_v38  ;;  %1802 = vmatpush3.bf16.msra.mxu1 %v1226_v32  ;;  %v1633_v48 = vcombine.low %v992_v41, %v1006_v57  ;;  %v215_v38 = vld [vmem:[%s1931_s28 + $0x40] sm:$0xf]  ;;  %v1649_v52 = vcombine.low %v1949_v13, %v1952_v14  ;;  %v1650_v10 = vcombine.low %v1955_v15, %v1958_v16  ;;  %v1311_v14 = vshll.u32 %v216_v59, 16 }
  0x3e   : > { %1787 = vmatprep.mubr.msk.bf16.mxu1 %vm276_vm1, %v1632_v40  ;;  %v1302_v49 = vshrl.u32 %v215_v38, 16  ;;  %v1305_v29 = vshll.u32 %v215_v38, 16  ;;  %v1642_v9 = vcombine.low %v2027_v11, %v215_v38  ;;  %v1657_v54 = vcombine.low %v2032_v12, %v2044_v24 }
  0x3f   : > { %v1658_v11 = vcombine.low %v2060_v36, %v2075_v2  ;;  %v1659_v15 = vcombine.low %v2081_v18, %v2093_v27  ;;  %v1313_v63 = vrot.slane %v1311_v14, 5 }
  0x40   : > { %v1304_v62 = vrot.slane %v1302_v49, 4  ;;  %v1307_v3 = vrot.slane %v1305_v29, 5 }
  0x42   : > { %v1308_v13 = vor.u32 %v1307_v3, %v1304_v62 }
  0x44   : > { %1794 = vmatmul.mubr.msk.bf16.vlgmr.msra.gmra.mxu0 %vm276_vm1, %v1640_v58  ;;  %1788 = vmatmul.mubr.msk.bf16.gmra.mxu1 %vm276_vm1, %v1633_v48  ;;  %v1309_v16 = vrot.slane %v1308_v13, 4 }
  0x45   : > { %1812 = vmatpush3.bf16.msra.mxu0 %v1335_v25  ;;  %1797 = vmatprep.mubr.msk.bf16.mxu0 %vm276_vm1, %v1641_v17 }
  0x46   : > { %1803 = vmatprep.mubr.msk.bf16.mxu1 %vm276_vm1, %v1648_v22  ;;  %v1314_v12 = vsel %vm2004_vm4, %v1309_v16, %v1313_v63 }
  0x47   : > { %v1660_v24 = vcombine.low %v2103_v39, %v1314_v12 }
  0x4c   : > { %1798 = vmatmul.mubr.msk.bf16.gmra.mxu0 %vm276_vm1, %v1642_v9  ;;  %1804 = vmatmul.mubr.msk.bf16.vlgmr.msra.gmra.mxu1 %vm276_vm1, %v1649_v52 }
  0x4d   : > { %1813 = vmatprep.mubr.msk.bf16.mxu0 %vm276_vm1, %v1657_v54  ;;  %1807 = vmatprep.mubr.msk.bf16.mxu1 %vm276_vm1, %v1650_v10 }
  0x54   : > { %1814 = vmatmul.mubr.msk.bf16.vlgmr.msra.gmra.mxu0 %vm276_vm1, %v1658_v11  ;;  %1808 = vmatmul.mubr.msk.bf16.gmra.mxu1 %vm276_vm1, %v1651_v55 }
  0x55   : > { %1817 = vmatprep.mubr.msk.bf16.mxu0 %vm276_vm1, %v1659_v15 }
  0x5c   : > { %1818 = vmatmul.mubr.msk.bf16.gmra.mxu0 %vm276_vm1, %v1660_v24 }
  0xd3   : > { %v1735_v51 = vpop.f32.mrf.mxu0 }
  0xd4   : > { %v1739_v36 = vpop.f32.mrf.mxu1 }
  0xd5   : > { %v327_v2 = vpop.f32.mrf.mxu0 }
  0xd6   : > { %v343_v53 = vpop.f32.mrf.mxu1 }
  0xd7   : > { %v1736_v27 = vpop.f32.mrf.mxu0 }
  0xd8   : > { %v1740_v18 = vpop.f32.mrf.mxu1 }
  0xd9   : > { %v330_v56 = vpop.f32.mrf.mxu0 }
  0xda   : > { %v2204_v0 = vpop.f32.mrf.mxu1 }
  0xdc   : > { %v1745_v1 = vpop.f32.mrf.mxu1 }
  0xdd   : > { %v436_v57 = vadd.f32 %v1745_v1, %v1735_v51 }
  0xde   : > { %v427_v60 = vpop.f32.mrf.mxu1 }
  0xdf   : > { %v428_v17 = vadd.f32 %v427_v60, %v327_v2 }
  0xe0   : > { %v1746_v35 = vpop.f32.mrf.mxu1 }
  0xe1   : > { %v439_v49 = vadd.f32 %v1746_v35, %v1736_v27 }
  0xe2   : > { %v1755_v6 = vpop.f32.mrf.mxu0  ;;  %v430_v8 = vpop.f32.mrf.mxu1 }
  0xe3   : > { %v669_v38 = vadd.f32 %v1755_v6, %v436_v57  ;;  %v431_v10 = vadd.f32 %v430_v8, %v330_v56 }
  0xe4   : > { %v636_v47 = vpop.f32.mrf.mxu0  ;;  %v1749_v20 = vpop.f32.mrf.mxu1 }
  0xe5   : > { %v667_v9 = vadd.f32 %v636_v47, %v428_v17  ;;  %v452_v14 = vadd.f32 %v1749_v20, %v1739_v36 }
  0xe6   : > { %v1756_v28 = vpop.f32.mrf.mxu0  ;;  %v443_v39 = vpop.f32.mrf.mxu1 }
  0xe7   : > { %v670_v59 = vadd.f32 %v1756_v28, %v439_v49  ;;  %v444_v11 = vadd.f32 %v443_v39, %v343_v53 }
  0xe8   : > { %v639_v30 = vpop.f32.mrf.mxu0  ;;  %v1750_v31 = vpop.f32.mrf.mxu1 }
  0xe9   : > { %v668_v63 = vadd.f32 %v639_v30, %v431_v10  ;;  %v455_v51 = vadd.f32 %v1750_v31, %v1740_v18 }
  0xea   : > { %v446_v61 = vpop.f32.mrf.mxu1 }
  0xeb   : > { %v447_v8 = vadd.f32 %v446_v61, %v2204_v0 }
  0xec   : > { %v1759_v23 = vpop.f32.mrf.mxu0  ;;  %v1765_v4 = vpop.f32.mrf.mxu1 }
  0xed   : > { %v779_v62 = vadd.f32 %v1765_v4, %v669_v38  ;;  %v673_v6 = vadd.f32 %v1759_v23, %v452_v14 }
  0xee   : > { %v652_v7 = vpop.f32.mrf.mxu0  ;;  %v746_v33 = vpop.f32.mrf.mxu1 }
  0xef   : > { %v777_v13 = vadd.f32 %v746_v33, %v667_v9  ;;  %v671_v56 = vadd.f32 %v652_v7, %v444_v11 }
  0xf0   : > { %v1760_v34 = vpop.f32.mrf.mxu0  ;;  %v1766_v37 = vpop.f32.mrf.mxu1 }
  0xf1   : > { %v780_v24 = vadd.f32 %v1766_v37, %v670_v59  ;;  %v674_v53 = vadd.f32 %v1760_v34, %v455_v51 }
  0xf2   : > { %v655_v43 = vpop.f32.mrf.mxu0  ;;  %v749_v44 = vpop.f32.mrf.mxu1 }
  0xf3   : > { %v778_v60 = vadd.f32 %v749_v44, %v668_v63 }
  0xf4   : > { %v1775_v46 = vpop.f32.mrf.mxu0  ;;  %v1769_v5 = vpop.f32.mrf.mxu1 }
  0xf5   : > { %v889_v12 = vadd.f32 %v1775_v46, %v779_v62  ;;  %v783_v20 = vadd.f32 %v1769_v5, %v673_v6  ;;  %v672_v46 = vadd.f32 %v655_v43, %v447_v8  ;;  %v2212_v43 = vld [vmem:[%s2263_s2] ss:$0 sm:$0xff] }
  0xf6   : > { %v856_v26 = vpop.f32.mrf.mxu0  ;;  %v762_v50 = vpop.f32.mrf.mxu1 }
  0xf7   : > { %v887_v27 = vadd.f32 %v856_v26, %v777_v13  ;;  %v781_v39 = vadd.f32 %v762_v50, %v671_v56 }
  0xf8   : > { %v1776_v45 = vpop.f32.mrf.mxu0  ;;  %v1770_v21 = vpop.f32.mrf.mxu1 }
  0xf9   : > { %v890_v4 = vadd.f32 %v1776_v45, %v780_v24  ;;  %v784_v26 = vadd.f32 %v1770_v21, %v674_v53 }
  0xfa   : > { %v859_v32 = vpop.f32.mrf.mxu0  ;;  %v765_v19 = vpop.f32.mrf.mxu1 }
  0xfb   : > { %v888_v37 = vadd.f32 %v859_v32, %v778_v60  ;;  %v782_v17 = vadd.f32 %v765_v19, %v672_v46 }
  0xfc   : > { %v1779_v40 = vpop.f32.mrf.mxu0  ;;  %v1785_v42 = vpop.f32.mrf.mxu1 }
  0xfd   : > { %v1103_v35 = vadd.f32 %v1785_v42, %v889_v12  ;;  %v893_v0 = vadd.f32 %v1779_v40, %v783_v20 }
  0xfe   : > { %v872_v55 = vpop.f32.mrf.mxu0  ;;  %v1070_v41 = vpop.f32.mrf.mxu1 }
  0xff   : > { %v1101_v36 = vadd.f32 %v1070_v41, %v887_v27  ;;  %v891_v61 = vadd.f32 %v872_v55, %v781_v39 }
 0x100   : > { %v1780_v58 = vpop.f32.mrf.mxu0  ;;  %v1786_v48 = vpop.f32.mrf.mxu1 }
 0x101   : > { %v1104_v31 = vadd.f32 %v1786_v48, %v890_v4  ;;  %v894_v50 = vadd.f32 %v1780_v58, %v784_v26  ;;  %v2218_v58 = vld [vmem:[%s2264_s3] ss:$0 sm:$0xff] }
 0x102   : > { %v2206_v22 = vpop.f32.mrf.mxu0  ;;  %v1073_v25 = vpop.f32.mrf.mxu1 }
 0x103   : > { %v1102_v7 = vadd.f32 %v1073_v25, %v888_v37  ;;  %v892_v19 = vadd.f32 %v2206_v22, %v782_v17 }
 0x104   : > { %v1795_v29 = vpop.f32.mrf.mxu0  ;;  %v1789_v52 = vpop.f32.mrf.mxu1 }
 0x105   : > { %v1199_v18 = vadd.f32 %v1795_v29, %v1103_v35  ;;  %v1107_v38 = vadd.f32 %v1789_v52, %v893_v0 }
 0x106   : > { %v1166_v3 = vpop.f32.mrf.mxu0  ;;  %v1086_v54 = vpop.f32.mrf.mxu1 }
 0x107   : > { %v1197_v23 = vadd.f32 %v1166_v3, %v1101_v36  ;;  %v1105_v49 = vadd.f32 %v1086_v54, %v891_v61 }
 0x108   : > { %v1796_v15 = vpop.f32.mrf.mxu0  ;;  %v1790_v16 = vpop.f32.mrf.mxu1 }
 0x109   : > { %v1200_v34 = vadd.f32 %v1796_v15, %v1104_v31  ;;  %v1108_v55 = vadd.f32 %v1790_v16, %v894_v50 }
 0x10a   : > { %v1169_v2 = vpop.f32.mrf.mxu0  ;;  %v1089_v1 = vpop.f32.mrf.mxu1 }
 0x10b   : > { %v1198_v48 = vadd.f32 %v1169_v2, %v1102_v7  ;;  %v1106_v59 = vadd.f32 %v1089_v1, %v892_v19 }
 0x10c   : > { %v1799_v47 = vpop.f32.mrf.mxu0  ;;  %v1805_v28 = vpop.f32.mrf.mxu1 }
 0x10d   : > { %v1295_v57 = vadd.f32 %v1805_v28, %v1199_v18  ;;  %v1203_v3 = vadd.f32 %v1799_v47, %v1107_v38 }
 0x10e   : > { %v1182_v30 = vpop.f32.mrf.mxu0  ;;  %v1262_v33 = vpop.f32.mrf.mxu1 }
 0x10f   : > { %v1293_v5 = vadd.f32 %v1262_v33, %v1197_v23  ;;  %v1201_v54 = vadd.f32 %v1182_v30, %v1105_v49 }
 0x110   : > { %v1800_v44 = vpop.f32.mrf.mxu0  ;;  %v1806_v42 = vpop.f32.mrf.mxu1 }
 0x111   : > { %v1296_v40 = vadd.f32 %v1806_v42, %v1200_v34  ;;  %v1204_v16 = vadd.f32 %v1800_v44, %v1108_v55 }
 0x112   : > { %v1185_v45 = vpop.f32.mrf.mxu0  ;;  %v1265_v41 = vpop.f32.mrf.mxu1 }
 0x113   : > { %v1294_v62 = vadd.f32 %v1265_v41, %v1198_v48  ;;  %v1202_v1 = vadd.f32 %v1185_v45, %v1106_v59 }
 0x114   : > { %v1815_v32 = vpop.f32.mrf.mxu0  ;;  %v1809_v21 = vpop.f32.mrf.mxu1 }
 0x115   : > { %v1404_v25 = vadd.f32 %v1815_v32, %v1295_v57  ;;  %v1299_v12 = vadd.f32 %v1809_v21, %v1203_v3 }
 0x116   : > { %v1371_v29 = vpop.f32.mrf.mxu0  ;;  %v1278_v52 = vpop.f32.mrf.mxu1 }
 0x117   : > { %v1419_v9 = vmul.f32 %v2212_v43, %v1404_v25  ;;  %v1402_v10 = vadd.f32 %v1371_v29, %v1293_v5  ;;  %v1297_v24 = vadd.f32 %v1278_v52, %v1201_v54 }
 0x118   : > { %v1816_v13 = vpop.f32.mrf.mxu0  ;;  %v1810_v14 = vpop.f32.mrf.mxu1 }
 0x119   : > { %v1434_v22 = vadd.f32 %v2218_v58, %v1419_v9  ;;  %v1417_v11 = vmul.f32 %v2212_v43, %v1402_v10  ;;  %v1405_v15 = vadd.f32 %v1816_v13, %v1296_v40  ;;  %v1300_v56 = vadd.f32 %v1810_v14, %v1204_v16 }
 0x11a   : > { %v1374_v63 = vpop.f32.mrf.mxu0  ;;  %v1281_v35 = vpop.f32.mrf.mxu1 }
 0x11b   : > { %v1442_v51 = vmax.f32 %v1434_v22, 0.0  ;;  %v1432_v2 = vadd.f32 %v2218_v58, %v1417_v11  ;;  %v1420_v27 = vmul.f32 %v2212_v43, %v1405_v15  ;;  %v1403_v60 = vadd.f32 %v1374_v63, %v1294_v62 }
 0x11c   : > { %v1819_v6 = vpop.f32.mrf.mxu0  ;;  %v1298_v20 = vadd.f32 %v1281_v35, %v1202_v1 }
 0x11d   : > { %v1680_v8 = vpack.c.bf16 %v1442_v51, %v1442_v51  ;;  %v1440_v47 = vmax.f32 %v1432_v2, 0.0  ;;  %v1435_v28 = vadd.f32 %v2218_v58, %v1420_v27  ;;  %v1418_v4 = vmul.f32 %v2212_v43, %v1403_v60 }
 0x11e   : > { %v1408_v36 = vadd.f32 %v1819_v6, %v1299_v12  ;;  %v1387_v53 = vpop.f32.mrf.mxu0 }
 0x11f   : > { %1483 = vst.msk [vmem:[%s2229_s16 + $0x8] sm:$0xf] %vm1480_vm5, %v1680_v8  ;;  %v1678_v39 = vpack.c.bf16 %v1440_v47, %v1440_v47  ;;  %v1443_v30 = vmax.f32 %v1435_v28, 0.0  ;;  %v1433_v33 = vadd.f32 %v2218_v58, %v1418_v4  ;;  %v1406_v37 = vadd.f32 %v1387_v53, %v1297_v24 }
 0x120   : > { %v1423_v18 = vmul.f32 %v2212_v43, %v1408_v36  ;;  %v1820_v31 = vpop.f32.mrf.mxu0 }
 0x121   : > { %1481 = vst.msk [vmem:[%s2229_s16] sm:$0xf] %vm1480_vm5, %v1678_v39  ;;  %v1681_v46 = vpack.c.bf16 %v1443_v30, %v1443_v30  ;;  %v1441_v26 = vmax.f32 %v1433_v33, 0.0  ;;  %v1421_v44 = vmul.f32 %v2212_v43, %v1406_v37  ;;  %v1409_v42 = vadd.f32 %v1820_v31, %v1300_v56 }
 0x122   : > { %v1438_v23 = vadd.f32 %v2218_v58, %v1423_v18  ;;  %v1390_v7 = vpop.f32.mrf.mxu0 }
 0x123   : > { %1484 = vst.msk [vmem:[%s2229_s16 + $0xc] sm:$0xf] %vm1480_vm5, %v1681_v46  ;;  %v1679_v57 = vpack.c.bf16 %v1441_v26, %v1441_v26  ;;  %v1436_v0 = vadd.f32 %v2218_v58, %v1421_v44  ;;  %v1424_v61 = vmul.f32 %v2212_v43, %v1409_v42  ;;  %v1407_v17 = vadd.f32 %v1390_v7, %v1298_v20 }
 0x124   : > { %v1446_v45 = vmax.f32 %v1438_v23, 0.0 }
 0x125   : > { %1482 = vst.msk [vmem:[%s2229_s16 + $0x4] sm:$0xf] %vm1480_vm5, %v1679_v57  ;;  %v1444_v41 = vmax.f32 %v1436_v0, 0.0  ;;  %v1439_v34 = vadd.f32 %v2218_v58, %v1424_v61  ;;  %v1422_v5 = vmul.f32 %v2212_v43, %v1407_v17 }
 0x126   : > { %v1684_v50 = vpack.c.bf16 %v1446_v45, %v1446_v45 }
 0x127   : > { %v1682_v38 = vpack.c.bf16 %v1444_v41, %v1444_v41  ;;  %v1447_v49 = vmax.f32 %v1439_v34, 0.0  ;;  %v1437_v32 = vadd.f32 %v2218_v58, %v1422_v5 }
 0x128   : > { %1487 = vst.msk [vmem:[%s2229_s16 + $0x18] sm:$0xf] %vm1480_vm5, %v1684_v50 }
 0x129   : > { %1485 = vst.msk [vmem:[%s2229_s16 + $0x10] sm:$0xf] %vm1480_vm5, %v1682_v38  ;;  %v1685_v21 = vpack.c.bf16 %v1447_v49, %v1447_v49  ;;  %v1445_v48 = vmax.f32 %v1437_v32, 0.0 }
 0x12b   : > { %1488 = vst.msk [vmem:[%s2229_s16 + $0x1c] sm:$0xf] %vm1480_vm5, %v1685_v21  ;;  %v1683_v25 = vpack.c.bf16 %v1445_v48, %v1445_v48 }
 0x12d   : > { %1486 = vst.msk [vmem:[%s2229_s16 + $0x14] sm:$0xf] %vm1480_vm5, %v1683_v25 }
 0x12e PF: > { %s14_s15 = sadd.s32 1, %s1872_s15  }
 0x12f   : > { %p11_p4 = scmp.ge.s32.totalorder %s14_s15, 4  }
 0x131   :  { %13 = sbr.rel (!%p11_p4) target bundleno = 1 (0x1), region = 77 }

</bundles_post_ra>
